<compile_context>
chip_gen: v6e
topology: v6e:2x2x1
jax: 0.10.0
libtpu: 0.0.40
codegen_flags: <defaults>
</compile_context>

<pallas_src>
import numpy as np

import jax
import jax.numpy as jnp
from jax import lax
from jax.experimental import pallas as pl
from jax.experimental.pallas import tpu as pltpu


# ----------------------------------------------------------------------------
# Host-side (one-time) weight repacking
# ----------------------------------------------------------------------------

def _banded_conv_weights(w_oihw, w_out):
    """Fold the kw shift + Cin contraction of a 3x3 conv into a banded matrix.

    w_oihw: (Cout, Cin, 3, 3) PyTorch-layout weights.
    Returns T of shape (3, (w_out+2)*Cin, w_out*Cout) such that
      conv_out[h, w*Cout+co] = sum_kh  x_padded_rows[h+kh, :] @ T[kh]
    where the input row layout is lane = w_padded*Cin + ci.
    """
    c_out, c_in, kh_n, kw_n = w_oihw.shape
    T = np.zeros((kh_n, (w_out + kw_n - 1) * c_in, w_out * c_out), np.float32)
    for kh in range(kh_n):
        for kw in range(kw_n):
            blk = w_oihw[:, :, kh, kw].T          # (Cin, Cout)
            for w in range(w_out):
                r0 = (w + kw) * c_in
                c0 = w * c_out
                T[kh, r0:r0 + c_in, c0:c0 + c_out] = blk
    return T


def _pool_row_select(h_out, pad):
    """(2, h_out+2*pad, 2*h_out) 0/1 matrices: even/odd row selection (+H halo)."""
    P = np.zeros((2, h_out + 2 * pad, 2 * h_out), np.float32)
    for par in range(2):
        for i in range(h_out):
            P[par, i + pad, 2 * i + par] = 1.0
    return P


def _pool_col_select(w_out, channels, pad):
    """(2, 2*w_out*C, (w_out+2*pad)*C) 0/1 matrices: even/odd column selection
    in the (w*C + c) lane layout (+W halo)."""
    P = np.zeros((2, 2 * w_out * channels, (w_out + 2 * pad) * channels), np.float32)
    for par in range(2):
        for j in range(w_out):
            for c in range(channels):
                P[par, (2 * j + par) * channels + c, (j + pad) * channels + c] = 1.0
    return P


def init_params(key):
    """Parameters in PyTorch layout: conv (Cout,Cin,kh,kw), fc (10, C*H*W)."""
    k = jax.random.split(key, 6)
    s = 0.1
    return {
        "conv1_w": s * jax.random.normal(k[0], (8, 1, 3, 3), jnp.float32),
        "conv1_b": s * jax.random.normal(k[1], (8,), jnp.float32),
        "conv2_w": s * jax.random.normal(k[2], (16, 8, 3, 3), jnp.float32),
        "conv2_b": s * jax.random.normal(k[3], (16,), jnp.float32),
        "fc_w": s * jax.random.normal(k[4], (10, 16 * 7 * 7), jnp.float32),
        "fc_b": s * jax.random.normal(k[5], (10,), jnp.float32),
    }


def prepare_operands(params):
    """One-time host repacking of PyTorch-layout params into kernel operands."""
    w1 = np.asarray(params["conv1_w"], np.float32)       # (8, 1, 3, 3)
    b1 = np.asarray(params["conv1_b"], np.float32)       # (8,)
    w2 = np.asarray(params["conv2_w"], np.float32)       # (16, 8, 3, 3)
    b2 = np.asarray(params["conv2_b"], np.float32)       # (16,)
    fw = np.asarray(params["fc_w"], np.float32)          # (10, 784)  (C,H,W order)
    fb = np.asarray(params["fc_b"], np.float32)          # (10,)

    # fc rows re-ordered from (c, h, w) to (h, w, c) so the kernel consumes the
    # pooled (h, w*16+c) tile directly (no activation transpose).
    wfc = np.transpose(fw.reshape(10, 16, 7, 7), (2, 3, 1, 0)).reshape(7, 7 * 16, 10)

    ops = {
        "T1": _banded_conv_weights(w1, 28),               # (3, 30, 224)
        "b1t": np.tile(b1, 28)[None, :],                  # (1, 224)   lane = w*8+c
        "HP1": _pool_row_select(14, pad=1),               # (2, 16, 28)
        "WP1": _pool_col_select(14, 8, pad=1),            # (2, 224, 128)
        "T2": _banded_conv_weights(w2, 14),               # (3, 128, 224)
        "b2t": np.tile(b2, 14)[None, :],                  # (1, 224)   lane = w*16+c
        "HP2": _pool_row_select(7, pad=0),                # (2, 7, 14)
        "WP2": _pool_col_select(7, 16, pad=0),            # (2, 224, 112)
        "Wfc": wfc,                                       # (7, 112, 10)
        "bfc": fb[None, :],                               # (1, 10)
    }
    return {k: jnp.asarray(v, jnp.float32) for k, v in ops.items()}


# ----------------------------------------------------------------------------
# Fused kernel: one image per grid step, everything in VMEM
# ----------------------------------------------------------------------------

def _cnn_fused_kernel(x_ref, t1_ref, b1_ref, hp1_ref, wp1_ref,
                      t2_ref, b2_ref, hp2_ref, wp2_ref, wfc_ref, bfc_ref,
                      o_ref):
    f32 = jnp.float32
    x = x_ref[0]                                               # (30, 30) padded image

    # conv1 + ReLU -> (28, 224), lane = w*8 + c_out
    c1 = jnp.dot(x[0:28, :], t1_ref[0], preferred_element_type=f32)
    for kh in (1, 2):
        c1 = c1 + jnp.dot(x[kh:kh + 28, :], t1_ref[kh], preferred_element_type=f32)
    c1 = jnp.maximum(c1 + b1_ref[...], 0.0)

    # 2x2 max-pool (+ zero halo for conv2) -> (16, 128), lane = w_pad*8 + c
    m1 = jnp.maximum(jnp.dot(hp1_ref[0], c1, preferred_element_type=f32),
                     jnp.dot(hp1_ref[1], c1, preferred_element_type=f32))
    p1 = jnp.maximum(jnp.dot(m1, wp1_ref[0], preferred_element_type=f32),
                     jnp.dot(m1, wp1_ref[1], preferred_element_type=f32))

    # conv2 + ReLU -> (14, 224), lane = w*16 + c_out
    c2 = jnp.dot(p1[0:14, :], t2_ref[0], preferred_element_type=f32)
    for kh in (1, 2):
        c2 = c2 + jnp.dot(p1[kh:kh + 14, :], t2_ref[kh], preferred_element_type=f32)
    c2 = jnp.maximum(c2 + b2_ref[...], 0.0)

    # 2x2 max-pool -> (7, 112), lane = w*16 + c
    m2 = jnp.maximum(jnp.dot(hp2_ref[0], c2, preferred_element_type=f32),
                     jnp.dot(hp2_ref[1], c2, preferred_element_type=f32))
    p2 = jnp.maximum(jnp.dot(m2, wp2_ref[0], preferred_element_type=f32),
                     jnp.dot(m2, wp2_ref[1], preferred_element_type=f32))

    # fully connected -> (1, 10)
    logits = bfc_ref[...]
    for h in range(7):
        logits = logits + jnp.dot(p2[h:h + 1, :], wfc_ref[h], preferred_element_type=f32)
    o_ref[0] = logits


def _const_spec(shape):
    zeros = (0,) * len(shape)
    return pl.BlockSpec(shape, lambda i, _z=zeros: _z)


def _compiler_params():
    cls = getattr(pltpu, "CompilerParams", None) or getattr(pltpu, "TPUCompilerParams", None)
    if cls is None:
        return None
    return cls(dimension_semantics=("parallel",))


@jax.jit
def cnn_forward(ops, x_nchw):
    # x_nchw: (N, 1, 28, 28) float32, same as the PyTorch module's input.
    x = x_nchw[:, 0, :, :]                                     # in_channel == 1
    xpad = jnp.pad(x, ((0, 0), (1, 1), (1, 1)))                # (N, 30, 30) halo
    n = xpad.shape[0]
    out = pl.pallas_call(
        _cnn_fused_kernel,
        out_shape=jax.ShapeDtypeStruct((n, 1, 10), jnp.float32),
        grid=(n,),
        in_specs=[
            pl.BlockSpec((1, 30, 30), lambda i: (i, 0, 0)),    # padded image
            _const_spec((3, 30, 224)),                         # T1
            _const_spec((1, 224)),                             # b1 tiled
            _const_spec((2, 16, 28)),                          # pool1 row select
            _const_spec((2, 224, 128)),                        # pool1 col select (+halo)
            _const_spec((3, 128, 224)),                        # T2
            _const_spec((1, 224)),                             # b2 tiled
            _const_spec((2, 7, 14)),                           # pool2 row select
            _const_spec((2, 224, 112)),                        # pool2 col select
            _const_spec((7, 112, 10)),                         # fc weight (permuted)
            _const_spec((1, 10)),                              # fc bias
        ],
        out_specs=pl.BlockSpec((1, 1, 10), lambda i: (i, 0, 0)),
        compiler_params=_compiler_params(),
    )(xpad, ops["T1"], ops["b1t"], ops["HP1"], ops["WP1"],
      ops["T2"], ops["b2t"], ops["HP2"], ops["WP2"], ops["Wfc"], ops["bfc"])
    return out[:, 0, :]


# ----------------------------------------------------------------------------
# Pure-JAX reference (matches the PyTorch module) for a correctness check
# ----------------------------------------------------------------------------

def reference_forward(params, x):
    hp = lax.Precision.HIGHEST

    def conv(y, w, b):
        out = lax.conv_general_dilated(
            y, w, window_strides=(1, 1), padding=((1, 1), (1, 1)),
            dimension_numbers=("NCHW", "OIHW", "NCHW"), precision=hp)
        return jax.nn.relu(out + b[None, :, None, None])

    def pool(y):
        return lax.reduce_window(y, -jnp.inf, lax.max,
                                 (1, 1, 2, 2), (1, 1, 2, 2), "VALID")

    y = pool(conv(x, params["conv1_w"], params["conv1_b"]))
    y = pool(conv(y, params["conv2_w"], params["conv2_b"]))
    y = y.reshape(y.shape[0], -1)
    return jnp.dot(y, params["fc_w"].T, precision=hp) + params["fc_b"]


if __name__ == "__main__":
    key = jax.random.PRNGKey(0)
    pkey, xkey = jax.random.split(key)
    params = init_params(pkey)
    ops = prepare_operands(params)

    # 28x28x1 is forced by the module (fc1 expects 16 * 7 * 7 features).
    x = jax.random.normal(xkey, (2, 1, 28, 28), dtype=jnp.float32)

    out = cnn_forward(ops, x)
    jax.block_until_ready(out)
    assert out.shape == (2, 10) and out.dtype == jnp.float32

    ref = reference_forward(params, x)
    np.testing.assert_allclose(np.asarray(out), np.asarray(ref),
                               rtol=1e-2, atol=1e-2)
    print("KERNEL_OK")
</pallas_src>

<mosaic_0001>
module attributes {stable_mosaic.version = 11 : i64} {
  func.func @_cnn_fused_kernel(%arg0: i32, %arg1: memref<1x30x30xf32, #tpu.memory_space<vmem>>, %arg2: memref<3x30x224xf32, #tpu.memory_space<vmem>>, %arg3: memref<1x224xf32, #tpu.memory_space<vmem>>, %arg4: memref<2x16x28xf32, #tpu.memory_space<vmem>>, %arg5: memref<2x224x128xf32, #tpu.memory_space<vmem>>, %arg6: memref<3x128x224xf32, #tpu.memory_space<vmem>>, %arg7: memref<1x224xf32, #tpu.memory_space<vmem>>, %arg8: memref<2x7x14xf32, #tpu.memory_space<vmem>>, %arg9: memref<2x224x112xf32, #tpu.memory_space<vmem>>, %arg10: memref<7x112x10xf32, #tpu.memory_space<vmem>>, %arg11: memref<1x10xf32, #tpu.memory_space<vmem>>, %arg12: memref<1x1x10xf32, #tpu.memory_space<vmem>>) attributes {dimension_semantics = [#tpu.dimension_semantics<parallel>], iteration_bounds = array<i64: 2>, scalar_prefetch = 0 : i64, scratch_operands = 0 : i64, tpu.core_type = #tpu.core_type<tc>, window_params = [{transform_indices = @transform_0, window_bounds = array<i64: 1, 30, 30>}, {pipeline_mode = #tpu.pipeline_mode<synchronous>, transform_indices = @transform_1, window_bounds = array<i64: 3, 30, 224>}, {pipeline_mode = #tpu.pipeline_mode<synchronous>, transform_indices = @transform_2, window_bounds = array<i64: 1, 224>}, {pipeline_mode = #tpu.pipeline_mode<synchronous>, transform_indices = @transform_3, window_bounds = array<i64: 2, 16, 28>}, {pipeline_mode = #tpu.pipeline_mode<synchronous>, transform_indices = @transform_4, window_bounds = array<i64: 2, 224, 128>}, {pipeline_mode = #tpu.pipeline_mode<synchronous>, transform_indices = @transform_5, window_bounds = array<i64: 3, 128, 224>}, {pipeline_mode = #tpu.pipeline_mode<synchronous>, transform_indices = @transform_6, window_bounds = array<i64: 1, 224>}, {pipeline_mode = #tpu.pipeline_mode<synchronous>, transform_indices = @transform_7, window_bounds = array<i64: 2, 7, 14>}, {pipeline_mode = #tpu.pipeline_mode<synchronous>, transform_indices = @transform_8, window_bounds = array<i64: 2, 224, 112>}, {pipeline_mode = #tpu.pipeline_mode<synchronous>, transform_indices = @transform_9, window_bounds = array<i64: 7, 112, 10>}, {pipeline_mode = #tpu.pipeline_mode<synchronous>, transform_indices = @transform_10, window_bounds = array<i64: 1, 10>}, {transform_indices = @transform_11, window_bounds = array<i64: 1, 1, 10>}]} {
    %c0 = arith.constant 0 : index
    %c0_0 = arith.constant 0 : index
    %c0_1 = arith.constant 0 : index
    %0 = vector.load %arg1[%c0, %c0_0, %c0_1] : memref<1x30x30xf32, #tpu.memory_space<vmem>>, vector<1x30x30xf32>
    %1 = vector.shape_cast %0 : vector<1x30x30xf32> to vector<30x30xf32>
    %2 = vector.extract_strided_slice %1 {offsets = [0, 0], sizes = [28, 30], strides = [1, 1]} : vector<30x30xf32> to vector<28x30xf32>
    %c0_2 = arith.constant 0 : index
    %c0_3 = arith.constant 0 : index
    %c0_4 = arith.constant 0 : index
    %3 = vector.load %arg2[%c0_2, %c0_3, %c0_4] : memref<3x30x224xf32, #tpu.memory_space<vmem>>, vector<1x30x224xf32>
    %4 = vector.shape_cast %3 : vector<1x30x224xf32> to vector<30x224xf32>
    %cst = arith.constant dense<0.000000e+00> : vector<28x224xf32>
    %5 = tpu.matmul %2, %4, %cst {dimension_numbers = #tpu.dot_dimension_numbers<[1], [0], [0], [1], [0, 0, 1, 1], [], []>} : vector<28x30xf32>, vector<30x224xf32>, vector<28x224xf32> -> vector<28x224xf32>
    %6 = vector.extract_strided_slice %1 {offsets = [1, 0], sizes = [28, 30], strides = [1, 1]} : vector<30x30xf32> to vector<28x30xf32>
    %c1 = arith.constant 1 : index
    %c0_5 = arith.constant 0 : index
    %c0_6 = arith.constant 0 : index
    %7 = vector.load %arg2[%c1, %c0_5, %c0_6] : memref<3x30x224xf32, #tpu.memory_space<vmem>>, vector<1x30x224xf32>
    %8 = vector.shape_cast %7 : vector<1x30x224xf32> to vector<30x224xf32>
    %cst_7 = arith.constant dense<0.000000e+00> : vector<28x224xf32>
    %9 = tpu.matmul %6, %8, %cst_7 {dimension_numbers = #tpu.dot_dimension_numbers<[1], [0], [0], [1], [0, 0, 1, 1], [], []>} : vector<28x30xf32>, vector<30x224xf32>, vector<28x224xf32> -> vector<28x224xf32>
    %10 = arith.addf %5, %9 : vector<28x224xf32>
    %11 = vector.extract_strided_slice %1 {offsets = [2, 0], sizes = [28, 30], strides = [1, 1]} : vector<30x30xf32> to vector<28x30xf32>
    %c2 = arith.constant 2 : index
    %c0_8 = arith.constant 0 : index
    %c0_9 = arith.constant 0 : index
    %12 = vector.load %arg2[%c2, %c0_8, %c0_9] : memref<3x30x224xf32, #tpu.memory_space<vmem>>, vector<1x30x224xf32>
    %13 = vector.shape_cast %12 : vector<1x30x224xf32> to vector<30x224xf32>
    %cst_10 = arith.constant dense<0.000000e+00> : vector<28x224xf32>
    %14 = tpu.matmul %11, %13, %cst_10 {dimension_numbers = #tpu.dot_dimension_numbers<[1], [0], [0], [1], [0, 0, 1, 1], [], []>} : vector<28x30xf32>, vector<30x224xf32>, vector<28x224xf32> -> vector<28x224xf32>
    %15 = arith.addf %10, %14 : vector<28x224xf32>
    %c0_11 = arith.constant 0 : index
    %c0_12 = arith.constant 0 : index
    %16 = vector.load %arg3[%c0_11, %c0_12] : memref<1x224xf32, #tpu.memory_space<vmem>>, vector<1x224xf32>
    %17 = vector.broadcast %16 : vector<1x224xf32> to vector<28x224xf32>
    %18 = arith.addf %15, %17 : vector<28x224xf32>
    %cst_13 = arith.constant 0.000000e+00 : f32
    %19 = vector.broadcast %cst_13 : f32 to vector<28x224xf32>
    %20 = arith.maximumf %18, %19 : vector<28x224xf32>
    %c0_14 = arith.constant 0 : index
    %c0_15 = arith.constant 0 : index
    %c0_16 = arith.constant 0 : index
    %21 = vector.load %arg4[%c0_14, %c0_15, %c0_16] : memref<2x16x28xf32, #tpu.memory_space<vmem>>, vector<1x16x28xf32>
    %22 = vector.shape_cast %21 : vector<1x16x28xf32> to vector<16x28xf32>
    %cst_17 = arith.constant dense<0.000000e+00> : vector<16x224xf32>
    %23 = tpu.matmul %22, %20, %cst_17 {dimension_numbers = #tpu.dot_dimension_numbers<[1], [0], [0], [1], [0, 0, 1, 1], [], []>} : vector<16x28xf32>, vector<28x224xf32>, vector<16x224xf32> -> vector<16x224xf32>
    %c1_18 = arith.constant 1 : index
    %c0_19 = arith.constant 0 : index
    %c0_20 = arith.constant 0 : index
    %24 = vector.load %arg4[%c1_18, %c0_19, %c0_20] : memref<2x16x28xf32, #tpu.memory_space<vmem>>, vector<1x16x28xf32>
    %25 = vector.shape_cast %24 : vector<1x16x28xf32> to vector<16x28xf32>
    %cst_21 = arith.constant dense<0.000000e+00> : vector<16x224xf32>
    %26 = tpu.matmul %25, %20, %cst_21 {dimension_numbers = #tpu.dot_dimension_numbers<[1], [0], [0], [1], [0, 0, 1, 1], [], []>} : vector<16x28xf32>, vector<28x224xf32>, vector<16x224xf32> -> vector<16x224xf32>
    %27 = arith.maximumf %23, %26 : vector<16x224xf32>
    %c0_22 = arith.constant 0 : index
    %c0_23 = arith.constant 0 : index
    %c0_24 = arith.constant 0 : index
    %28 = vector.load %arg5[%c0_22, %c0_23, %c0_24] : memref<2x224x128xf32, #tpu.memory_space<vmem>>, vector<1x224x128xf32>
    %29 = vector.shape_cast %28 : vector<1x224x128xf32> to vector<224x128xf32>
    %cst_25 = arith.constant dense<0.000000e+00> : vector<16x128xf32>
    %30 = tpu.matmul %27, %29, %cst_25 {dimension_numbers = #tpu.dot_dimension_numbers<[1], [0], [0], [1], [0, 0, 1, 1], [], []>} : vector<16x224xf32>, vector<224x128xf32>, vector<16x128xf32> -> vector<16x128xf32>
    %c1_26 = arith.constant 1 : index
    %c0_27 = arith.constant 0 : index
    %c0_28 = arith.constant 0 : index
    %31 = vector.load %arg5[%c1_26, %c0_27, %c0_28] : memref<2x224x128xf32, #tpu.memory_space<vmem>>, vector<1x224x128xf32>
    %32 = vector.shape_cast %31 : vector<1x224x128xf32> to vector<224x128xf32>
    %cst_29 = arith.constant dense<0.000000e+00> : vector<16x128xf32>
    %33 = tpu.matmul %27, %32, %cst_29 {dimension_numbers = #tpu.dot_dimension_numbers<[1], [0], [0], [1], [0, 0, 1, 1], [], []>} : vector<16x224xf32>, vector<224x128xf32>, vector<16x128xf32> -> vector<16x128xf32>
    %34 = arith.maximumf %30, %33 : vector<16x128xf32>
    %35 = vector.extract_strided_slice %34 {offsets = [0, 0], sizes = [14, 128], strides = [1, 1]} : vector<16x128xf32> to vector<14x128xf32>
    %c0_30 = arith.constant 0 : index
    %c0_31 = arith.constant 0 : index
    %c0_32 = arith.constant 0 : index
    %36 = vector.load %arg6[%c0_30, %c0_31, %c0_32] : memref<3x128x224xf32, #tpu.memory_space<vmem>>, vector<1x128x224xf32>
    %37 = vector.shape_cast %36 : vector<1x128x224xf32> to vector<128x224xf32>
    %cst_33 = arith.constant dense<0.000000e+00> : vector<14x224xf32>
    %38 = tpu.matmul %35, %37, %cst_33 {dimension_numbers = #tpu.dot_dimension_numbers<[1], [0], [0], [1], [0, 0, 1, 1], [], []>} : vector<14x128xf32>, vector<128x224xf32>, vector<14x224xf32> -> vector<14x224xf32>
    %39 = vector.extract_strided_slice %34 {offsets = [1, 0], sizes = [14, 128], strides = [1, 1]} : vector<16x128xf32> to vector<14x128xf32>
    %c1_34 = arith.constant 1 : index
    %c0_35 = arith.constant 0 : index
    %c0_36 = arith.constant 0 : index
    %40 = vector.load %arg6[%c1_34, %c0_35, %c0_36] : memref<3x128x224xf32, #tpu.memory_space<vmem>>, vector<1x128x224xf32>
    %41 = vector.shape_cast %40 : vector<1x128x224xf32> to vector<128x224xf32>
    %cst_37 = arith.constant dense<0.000000e+00> : vector<14x224xf32>
    %42 = tpu.matmul %39, %41, %cst_37 {dimension_numbers = #tpu.dot_dimension_numbers<[1], [0], [0], [1], [0, 0, 1, 1], [], []>} : vector<14x128xf32>, vector<128x224xf32>, vector<14x224xf32> -> vector<14x224xf32>
    %43 = arith.addf %38, %42 : vector<14x224xf32>
    %44 = vector.extract_strided_slice %34 {offsets = [2, 0], sizes = [14, 128], strides = [1, 1]} : vector<16x128xf32> to vector<14x128xf32>
    %c2_38 = arith.constant 2 : index
    %c0_39 = arith.constant 0 : index
    %c0_40 = arith.constant 0 : index
    %45 = vector.load %arg6[%c2_38, %c0_39, %c0_40] : memref<3x128x224xf32, #tpu.memory_space<vmem>>, vector<1x128x224xf32>
    %46 = vector.shape_cast %45 : vector<1x128x224xf32> to vector<128x224xf32>
    %cst_41 = arith.constant dense<0.000000e+00> : vector<14x224xf32>
    %47 = tpu.matmul %44, %46, %cst_41 {dimension_numbers = #tpu.dot_dimension_numbers<[1], [0], [0], [1], [0, 0, 1, 1], [], []>} : vector<14x128xf32>, vector<128x224xf32>, vector<14x224xf32> -> vector<14x224xf32>
    %48 = arith.addf %43, %47 : vector<14x224xf32>
    %c0_42 = arith.constant 0 : index
    %c0_43 = arith.constant 0 : index
    %49 = vector.load %arg7[%c0_42, %c0_43] : memref<1x224xf32, #tpu.memory_space<vmem>>, vector<1x224xf32>
    %50 = vector.broadcast %49 : vector<1x224xf32> to vector<14x224xf32>
    %51 = arith.addf %48, %50 : vector<14x224xf32>
    %cst_44 = arith.constant 0.000000e+00 : f32
    %52 = vector.broadcast %cst_44 : f32 to vector<14x224xf32>
    %53 = arith.maximumf %51, %52 : vector<14x224xf32>
    %c0_45 = arith.constant 0 : index
    %c0_46 = arith.constant 0 : index
    %c0_47 = arith.constant 0 : index
    %54 = vector.load %arg8[%c0_45, %c0_46, %c0_47] : memref<2x7x14xf32, #tpu.memory_space<vmem>>, vector<1x7x14xf32>
    %55 = vector.shape_cast %54 : vector<1x7x14xf32> to vector<7x14xf32>
    %cst_48 = arith.constant dense<0.000000e+00> : vector<7x224xf32>
    %56 = tpu.matmul %55, %53, %cst_48 {dimension_numbers = #tpu.dot_dimension_numbers<[1], [0], [0], [1], [0, 0, 1, 1], [], []>} : vector<7x14xf32>, vector<14x224xf32>, vector<7x224xf32> -> vector<7x224xf32>
    %c1_49 = arith.constant 1 : index
    %c0_50 = arith.constant 0 : index
    %c0_51 = arith.constant 0 : index
    %57 = vector.load %arg8[%c1_49, %c0_50, %c0_51] : memref<2x7x14xf32, #tpu.memory_space<vmem>>, vector<1x7x14xf32>
    %58 = vector.shape_cast %57 : vector<1x7x14xf32> to vector<7x14xf32>
    %cst_52 = arith.constant dense<0.000000e+00> : vector<7x224xf32>
    %59 = tpu.matmul %58, %53, %cst_52 {dimension_numbers = #tpu.dot_dimension_numbers<[1], [0], [0], [1], [0, 0, 1, 1], [], []>} : vector<7x14xf32>, vector<14x224xf32>, vector<7x224xf32> -> vector<7x224xf32>
    %60 = arith.maximumf %56, %59 : vector<7x224xf32>
    %c0_53 = arith.constant 0 : index
    %c0_54 = arith.constant 0 : index
    %c0_55 = arith.constant 0 : index
    %61 = vector.load %arg9[%c0_53, %c0_54, %c0_55] : memref<2x224x112xf32, #tpu.memory_space<vmem>>, vector<1x224x112xf32>
    %62 = vector.shape_cast %61 : vector<1x224x112xf32> to vector<224x112xf32>
    %cst_56 = arith.constant dense<0.000000e+00> : vector<7x112xf32>
    %63 = tpu.matmul %60, %62, %cst_56 {dimension_numbers = #tpu.dot_dimension_numbers<[1], [0], [0], [1], [0, 0, 1, 1], [], []>} : vector<7x224xf32>, vector<224x112xf32>, vector<7x112xf32> -> vector<7x112xf32>
    %c1_57 = arith.constant 1 : index
    %c0_58 = arith.constant 0 : index
    %c0_59 = arith.constant 0 : index
    %64 = vector.load %arg9[%c1_57, %c0_58, %c0_59] : memref<2x224x112xf32, #tpu.memory_space<vmem>>, vector<1x224x112xf32>
    %65 = vector.shape_cast %64 : vector<1x224x112xf32> to vector<224x112xf32>
    %cst_60 = arith.constant dense<0.000000e+00> : vector<7x112xf32>
    %66 = tpu.matmul %60, %65, %cst_60 {dimension_numbers = #tpu.dot_dimension_numbers<[1], [0], [0], [1], [0, 0, 1, 1], [], []>} : vector<7x224xf32>, vector<224x112xf32>, vector<7x112xf32> -> vector<7x112xf32>
    %67 = arith.maximumf %63, %66 : vector<7x112xf32>
    %c0_61 = arith.constant 0 : index
    %c0_62 = arith.constant 0 : index
    %68 = vector.load %arg11[%c0_61, %c0_62] : memref<1x10xf32, #tpu.memory_space<vmem>>, vector<1x10xf32>
    %69 = vector.extract_strided_slice %67 {offsets = [0, 0], sizes = [1, 112], strides = [1, 1]} : vector<7x112xf32> to vector<1x112xf32>
    %c0_63 = arith.constant 0 : index
    %c0_64 = arith.constant 0 : index
    %c0_65 = arith.constant 0 : index
    %70 = vector.load %arg10[%c0_63, %c0_64, %c0_65] : memref<7x112x10xf32, #tpu.memory_space<vmem>>, vector<1x112x10xf32>
    %71 = vector.shape_cast %70 : vector<1x112x10xf32> to vector<112x10xf32>
    %cst_66 = arith.constant dense<0.000000e+00> : vector<1x10xf32>
    %72 = tpu.matmul %69, %71, %cst_66 {dimension_numbers = #tpu.dot_dimension_numbers<[1], [0], [0], [1], [0, 0, 1, 1], [], []>} : vector<1x112xf32>, vector<112x10xf32>, vector<1x10xf32> -> vector<1x10xf32>
    %73 = arith.addf %68, %72 : vector<1x10xf32>
    %74 = vector.extract_strided_slice %67 {offsets = [1, 0], sizes = [1, 112], strides = [1, 1]} : vector<7x112xf32> to vector<1x112xf32>
    %c1_67 = arith.constant 1 : index
    %c0_68 = arith.constant 0 : index
    %c0_69 = arith.constant 0 : index
    %75 = vector.load %arg10[%c1_67, %c0_68, %c0_69] : memref<7x112x10xf32, #tpu.memory_space<vmem>>, vector<1x112x10xf32>
    %76 = vector.shape_cast %75 : vector<1x112x10xf32> to vector<112x10xf32>
    %cst_70 = arith.constant dense<0.000000e+00> : vector<1x10xf32>
    %77 = tpu.matmul %74, %76, %cst_70 {dimension_numbers = #tpu.dot_dimension_numbers<[1], [0], [0], [1], [0, 0, 1, 1], [], []>} : vector<1x112xf32>, vector<112x10xf32>, vector<1x10xf32> -> vector<1x10xf32>
    %78 = arith.addf %73, %77 : vector<1x10xf32>
    %79 = vector.extract_strided_slice %67 {offsets = [2, 0], sizes = [1, 112], strides = [1, 1]} : vector<7x112xf32> to vector<1x112xf32>
    %c2_71 = arith.constant 2 : index
    %c0_72 = arith.constant 0 : index
    %c0_73 = arith.constant 0 : index
    %80 = vector.load %arg10[%c2_71, %c0_72, %c0_73] : memref<7x112x10xf32, #tpu.memory_space<vmem>>, vector<1x112x10xf32>
    %81 = vector.shape_cast %80 : vector<1x112x10xf32> to vector<112x10xf32>
    %cst_74 = arith.constant dense<0.000000e+00> : vector<1x10xf32>
    %82 = tpu.matmul %79, %81, %cst_74 {dimension_numbers = #tpu.dot_dimension_numbers<[1], [0], [0], [1], [0, 0, 1, 1], [], []>} : vector<1x112xf32>, vector<112x10xf32>, vector<1x10xf32> -> vector<1x10xf32>
    %83 = arith.addf %78, %82 : vector<1x10xf32>
    %84 = vector.extract_strided_slice %67 {offsets = [3, 0], sizes = [1, 112], strides = [1, 1]} : vector<7x112xf32> to vector<1x112xf32>
    %c3 = arith.constant 3 : index
    %c0_75 = arith.constant 0 : index
    %c0_76 = arith.constant 0 : index
    %85 = vector.load %arg10[%c3, %c0_75, %c0_76] : memref<7x112x10xf32, #tpu.memory_space<vmem>>, vector<1x112x10xf32>
    %86 = vector.shape_cast %85 : vector<1x112x10xf32> to vector<112x10xf32>
    %cst_77 = arith.constant dense<0.000000e+00> : vector<1x10xf32>
    %87 = tpu.matmul %84, %86, %cst_77 {dimension_numbers = #tpu.dot_dimension_numbers<[1], [0], [0], [1], [0, 0, 1, 1], [], []>} : vector<1x112xf32>, vector<112x10xf32>, vector<1x10xf32> -> vector<1x10xf32>
    %88 = arith.addf %83, %87 : vector<1x10xf32>
    %89 = vector.extract_strided_slice %67 {offsets = [4, 0], sizes = [1, 112], strides = [1, 1]} : vector<7x112xf32> to vector<1x112xf32>
    %c4 = arith.constant 4 : index
    %c0_78 = arith.constant 0 : index
    %c0_79 = arith.constant 0 : index
    %90 = vector.load %arg10[%c4, %c0_78, %c0_79] : memref<7x112x10xf32, #tpu.memory_space<vmem>>, vector<1x112x10xf32>
    %91 = vector.shape_cast %90 : vector<1x112x10xf32> to vector<112x10xf32>
    %cst_80 = arith.constant dense<0.000000e+00> : vector<1x10xf32>
    %92 = tpu.matmul %89, %91, %cst_80 {dimension_numbers = #tpu.dot_dimension_numbers<[1], [0], [0], [1], [0, 0, 1, 1], [], []>} : vector<1x112xf32>, vector<112x10xf32>, vector<1x10xf32> -> vector<1x10xf32>
    %93 = arith.addf %88, %92 : vector<1x10xf32>
    %94 = vector.extract_strided_slice %67 {offsets = [5, 0], sizes = [1, 112], strides = [1, 1]} : vector<7x112xf32> to vector<1x112xf32>
    %c5 = arith.constant 5 : index
    %c0_81 = arith.constant 0 : index
    %c0_82 = arith.constant 0 : index
    %95 = vector.load %arg10[%c5, %c0_81, %c0_82] : memref<7x112x10xf32, #tpu.memory_space<vmem>>, vector<1x112x10xf32>
    %96 = vector.shape_cast %95 : vector<1x112x10xf32> to vector<112x10xf32>
    %cst_83 = arith.constant dense<0.000000e+00> : vector<1x10xf32>
    %97 = tpu.matmul %94, %96, %cst_83 {dimension_numbers = #tpu.dot_dimension_numbers<[1], [0], [0], [1], [0, 0, 1, 1], [], []>} : vector<1x112xf32>, vector<112x10xf32>, vector<1x10xf32> -> vector<1x10xf32>
    %98 = arith.addf %93, %97 : vector<1x10xf32>
    %99 = vector.extract_strided_slice %67 {offsets = [6, 0], sizes = [1, 112], strides = [1, 1]} : vector<7x112xf32> to vector<1x112xf32>
    %c6 = arith.constant 6 : index
    %c0_84 = arith.constant 0 : index
    %c0_85 = arith.constant 0 : index
    %100 = vector.load %arg10[%c6, %c0_84, %c0_85] : memref<7x112x10xf32, #tpu.memory_space<vmem>>, vector<1x112x10xf32>
    %101 = vector.shape_cast %100 : vector<1x112x10xf32> to vector<112x10xf32>
    %cst_86 = arith.constant dense<0.000000e+00> : vector<1x10xf32>
    %102 = tpu.matmul %99, %101, %cst_86 {dimension_numbers = #tpu.dot_dimension_numbers<[1], [0], [0], [1], [0, 0, 1, 1], [], []>} : vector<1x112xf32>, vector<112x10xf32>, vector<1x10xf32> -> vector<1x10xf32>
    %103 = arith.addf %98, %102 : vector<1x10xf32>
    %c0_87 = arith.constant 0 : index
    %c0_88 = arith.constant 0 : index
    %c0_89 = arith.constant 0 : index
    %104 = vector.load %arg12[%c0_87, %c0_88, %c0_89] : memref<1x1x10xf32, #tpu.memory_space<vmem>>, vector<1x1x10xf32>
    %105 = vector.shape_cast %104 : vector<1x1x10xf32> to vector<1x10xf32>
    %106 = vector.shape_cast %103 : vector<1x10xf32> to vector<1x1x10xf32>
    tpu.vector_store %arg12[%c0_87, %c0_88, %c0_89], %106 {strides = array<i32>} : memref<1x1x10xf32, #tpu.memory_space<vmem>>, vector<1x1x10xf32>,
    return
  }
  func.func @transform_0(%arg0: i32) -> (i32, i32, i32) {
    %c0_i32 = arith.constant 0 : i32
    %c0_i32_0 = arith.constant 0 : i32
    %c0_i32_1 = arith.constant 0 : i32
    return %arg0, %c0_i32, %c0_i32_0 : i32, i32, i32
  }
  func.func @transform_1(%arg0: i32) -> (i32, i32, i32) {
    %c0_i32 = arith.constant 0 : i32
    %c0_i32_0 = arith.constant 0 : i32
    %c0_i32_1 = arith.constant 0 : i32
    %c0_i32_2 = arith.constant 0 : i32
    return %c0_i32, %c0_i32_0, %c0_i32_1 : i32, i32, i32
  }
  func.func @transform_2(%arg0: i32) -> (i32, i32) {
    %c0_i32 = arith.constant 0 : i32
    %c0_i32_0 = arith.constant 0 : i32
    %c0_i32_1 = arith.constant 0 : i32
    return %c0_i32, %c0_i32_0 : i32, i32
  }
  func.func @transform_3(%arg0: i32) -> (i32, i32, i32) {
    %c0_i32 = arith.constant 0 : i32
    %c0_i32_0 = arith.constant 0 : i32
    %c0_i32_1 = arith.constant 0 : i32
    %c0_i32_2 = arith.constant 0 : i32
    return %c0_i32, %c0_i32_0, %c0_i32_1 : i32, i32, i32
  }
  func.func @transform_4(%arg0: i32) -> (i32, i32, i32) {
    %c0_i32 = arith.constant 0 : i32
    %c0_i32_0 = arith.constant 0 : i32
    %c0_i32_1 = arith.constant 0 : i32
    %c0_i32_2 = arith.constant 0 : i32
    return %c0_i32, %c0_i32_0, %c0_i32_1 : i32, i32, i32
  }
  func.func @transform_5(%arg0: i32) -> (i32, i32, i32) {
    %c0_i32 = arith.constant 0 : i32
    %c0_i32_0 = arith.constant 0 : i32
    %c0_i32_1 = arith.constant 0 : i32
    %c0_i32_2 = arith.constant 0 : i32
    return %c0_i32, %c0_i32_0, %c0_i32_1 : i32, i32, i32
  }
  func.func @transform_6(%arg0: i32) -> (i32, i32) {
    %c0_i32 = arith.constant 0 : i32
    %c0_i32_0 = arith.constant 0 : i32
    %c0_i32_1 = arith.constant 0 : i32
    return %c0_i32, %c0_i32_0 : i32, i32
  }
  func.func @transform_7(%arg0: i32) -> (i32, i32, i32) {
    %c0_i32 = arith.constant 0 : i32
    %c0_i32_0 = arith.constant 0 : i32
    %c0_i32_1 = arith.constant 0 : i32
    %c0_i32_2 = arith.constant 0 : i32
    return %c0_i32, %c0_i32_0, %c0_i32_1 : i32, i32, i32
  }
  func.func @transform_8(%arg0: i32) -> (i32, i32, i32) {
    %c0_i32 = arith.constant 0 : i32
    %c0_i32_0 = arith.constant 0 : i32
    %c0_i32_1 = arith.constant 0 : i32
    %c0_i32_2 = arith.constant 0 : i32
    return %c0_i32, %c0_i32_0, %c0_i32_1 : i32, i32, i32
  }
  func.func @transform_9(%arg0: i32) -> (i32, i32, i32) {
    %c0_i32 = arith.constant 0 : i32
    %c0_i32_0 = arith.constant 0 : i32
    %c0_i32_1 = arith.constant 0 : i32
    %c0_i32_2 = arith.constant 0 : i32
    return %c0_i32, %c0_i32_0, %c0_i32_1 : i32, i32, i32
  }
  func.func @transform_10(%arg0: i32) -> (i32, i32) {
    %c0_i32 = arith.constant 0 : i32
    %c0_i32_0 = arith.constant 0 : i32
    %c0_i32_1 = arith.constant 0 : i32
    return %c0_i32, %c0_i32_0 : i32, i32
  }
  func.func @transform_11(%arg0: i32) -> (i32, i32, i32) {
    %c0_i32 = arith.constant 0 : i32
    %c0_i32_0 = arith.constant 0 : i32
    %c0_i32_1 = arith.constant 0 : i32
    return %arg0, %c0_i32, %c0_i32_0 : i32, i32, i32
  }
}

</mosaic_0001>

<bundles_post_ra>
// kernel: cnn_forward.1
= control target key start
LH: loop header
LB: loop body
LE: loop exit
PB: predicated region body
PF: predicated region fallthrough
CT: control target
= control target key end

     0   :  { %16 = vsyncpa [#allocation3], 0  ;;  %s4825_s0 = inlined_call_operand.vmem [shape: f32[2,30,30], index: 0, kind: input, shape index: {}]   ;;  %s4826_s1 = inlined_call_operand.vmem [shape: f32[3,30,224], index: 1, kind: input, shape index: {}]   ;;  %s4827_s2 = inlined_call_operand.vmem [shape: f32[1,224], index: 2, kind: input, shape index: {}]   ;;  %s4828_s3 = inlined_call_operand.vmem [shape: f32[2,16,28], index: 3, kind: input, shape index: {}]   ;;  %s4829_s4 = inlined_call_operand.vmem [shape: f32[2,224,128], index: 4, kind: input, shape index: {}]   ;;  %s4830_s5 = inlined_call_operand.vmem [shape: f32[3,128,224], index: 5, kind: input, shape index: {}]   ;;  %s4831_s6 = inlined_call_operand.vmem [shape: f32[1,224], index: 6, kind: input, shape index: {}]   ;;  %s4832_s7 = inlined_call_operand.vmem [shape: f32[2,7,14], index: 7, kind: input, shape index: {}]   ;;  %s4833_s8 = inlined_call_operand.vmem [shape: f32[2,224,112], index: 8, kind: input, shape index: {}]   ;;  %s4834_s9 = inlined_call_operand.vmem [shape: f32[7,112,10], index: 9, kind: input, shape index: {}]   ;;  %s4835_s10 = inlined_call_operand.vmem [shape: f32[1,10], index: 10, kind: input, shape index: {}]   ;;  %s4836_s11 = inlined_call_operand.hbm [shape: f32[2,1,10], index: 11, kind: output, shape index: {}]  }
   0x1   :  { %18 = vsyncpa [#allocation3 + $0x1], 0  ;;  %s3373_s17 = smov 0   ;;  %s3375_s18 = smov 0  }
   0x2   :  { %s3377_s19 = smov 0   ;;  %s3379_s20 = smov 0  }
   0x3 LB: > { %4840 = sst [smem:[#allocation5_spill]] %s3304_s19  ;;  %s3394_s21 = sadd.s32 4294967295, %s3308_s20   ;;  %s3308_s20 = sphi %s3379_s20, %s4845_s20   ;;  %s3304_s19 = sphi %s3377_s19, %s4847_s19   ;;  %s3300_s18 = sphi %s3375_s18, %s4849_s18   ;;  %s3296_s17 = sphi %s3373_s17, %s4848_s17  }
   0x4   : > { %s2599_s22 = sadd.s32 4294967294, %s3308_s20   ;;  %s3398_s23 = sadd.s32 1, %s3308_s20  }
   0x5   : > { %4841 = sst [smem:[#allocation6_spill]] %s3398_s23  ;;  %s267_s24 = sadd.s32 1, %s3304_s19 }
   0x6   : > { %s264_s25 = ssub.s32 %s3308_s20, %s3398_s23  ;;  %p277_p0 = scmp.ne.s32.totalorder %s3304_s19, %s3300_s18 }
   0x7   : > { %p265_p1 = scmp.eq.s32.totalorder %s264_s25, 0  ;;  %p278_p2 = scmp.eq.s32.totalorder %s3394_s21, 1 }
   0x8   : > { %p283_p3 = scmp.ne.s32.totalorder %s3300_s18, %s3296_s17  ;;  %p284_p4 = scmp.eq.s32.totalorder %s2599_s22, 1 }
   0x9   : > { %s3409_s26 = scalar_select %p265_p1, %s3304_s19, %s267_s24  }
   0xa   : > { %p3411_p5 = por %p278_p2, %p277_p0  ;;  %p3415_p6 = por %p284_p4, %p283_p3 }
   0xb   : > { %4842 = sst [smem:[#allocation7_spill]] %s3409_s26  ;;  %p2602_p7 = scmp.ge.s32.totalorder %s3308_s20, 1 }
   0xc   : > { %p340_p8 = scmp.lt.s32.totalorder %s3308_s20, 3 }
   0xe   : > { %p341_p9 = pnand %p2602_p7, %p340_p8 }
   0xf   : > { %p379_p10 = scmp.lt.s32.totalorder (!%p341_p9), %s3394_s21, 1  ;;  %s377_s30 = sand.u32 (!%p341_p9), 1, %s3300_s18  }
  0x10   : > { %344 = sbr.rel (%p341_p9) target bundleno = 1618 (0x652), region = 64  ;;  %s378_s26 = scalar_lea.vmem (!%p341_p9), [#allocation2], %s377_s30 }
  0x11   : > { %s2544_s13 = sshll.u32 (!%p341_p9), %s378_s26, 4  ;;  %s2532_s15 = scalar_lea.sflag (!%p341_p9), [#allocation3], %s377_s30  ;;  %s2545_s13 = int_to_ptr.vmem [resolvable:$true] %s2544_s13 }
  0x12   : > { %s3248_s16 = scalar_lea.vmem (!%p341_p9), %s2545_s13, 16 }
  0x13   : > { %p3249_p11 = scmp.ne.s32.totalorder (!%p341_p9), %s2545_s13, %s3248_s16 }
  0x15   : > { %v2612_v0 = vld [vmem:[%s4826_s1 + $0x78] sm:$0x3f]  ;;  %vm426_vm0 = vcmask 1045504   ;;  %v2611_v1 = vld [vmem:[%s4826_s1 + $0x70] sm:$0x3f]  ;;  %v2610_v2 = vld [vmem:[%s4826_s1 + $0x68] sm:$0xff]  ;;  %p3250_p12 = pnand %p3249_p11, %p3411_p5 }
  0x16   : > { %2613 = vmatprep.subr.msk.mxu0 %vm426_vm0, %v2612_v0  ;;  %v2609_v3 = vld [vmem:[%s4826_s1 + $0x60] sm:$0xff]  ;;  %v2608_v4 = vld [vmem:[%s4826_s1 + $0x58] sm:$0xff]  ;;  %v2607_v5 = vld [vmem:[%s4826_s1 + $0x50] sm:$0xff]  ;;  %v3310_v6 = vmov 0.0   ;;  %s380_s14 = scalar_select %p379_p10, %s3394_s21, 1  ;;  %vm409_vm1 = vcmask 1046528  }
  0x17   : > { %2614 = vmatpush1.msk.msra.mxu0 %vm426_vm0, %v2611_v1  ;;  %497 = vmatprep.mubr.f32.mxu0 %v3310_v6  ;;  %v395_v7 = vld [vmem:[%s4826_s1 + $0x38] sm:$0x3f]  ;;  %v394_v8 = vld [vmem:[%s4826_s1 + $0x30] sm:$0x3f]  ;;  %v393_v9 = vld [vmem:[%s4826_s1 + $0x28] sm:$0xff]  ;;  %vm417_vm2 = vcmask 244736   ;;  %p3251_p13 = pneg %p3250_p12 }
  0x18   : > { %459 = vmatprep.subr.mxu0 %v2610_v2  ;;  %3199 = vmatprep.subr.msk.mxu1 %vm426_vm0, %v395_v7  ;;  %v392_v10 = vld [vmem:[%s4826_s1 + $0x20] sm:$0xff]  ;;  %v2606_v11 = vld [vmem:[%s4826_s1 + $0x48] sm:$0xff]  ;;  %v391_v12 = vld [vmem:[%s4826_s1 + $0x18] sm:$0xff]  ;;  %s2876_s22 = sshll.u32 %s380_s14, 5  ;;  %vm789_vm3 = vcmask 1043456   ;;  %vm782_vm4 = vcmask 228352  }
  0x19   : > { %460 = vmatpush1.msra.mxu0 %v2609_v3  ;;  %3203 = vmatpush1.msk.msra.mxu1 %vm426_vm0, %v394_v8  ;;  %v2605_v13 = vld [vmem:[%s4826_s1 + $0x40] sm:$0xff]  ;;  %v390_v14 = vld [vmem:[%s4826_s1 + $0x10] sm:$0xff]  ;;  %s383_s12 = scalar_lea.vmem %s4825_s0, %s2876_s22  ;;  %v389_v15 = vld [vmem:[%s4826_s1 + $0x8] sm:$0xff]  ;;  %vm991_vm5 = vcmask 785408   ;;  %vm1545_vm6 = vcmask 113664   ;;  %vm3311_vm7 = vmmov 0  }
  0x1a   : > { %461 = vmatprep.subr.mxu0 %v2608_v4  ;;  %3200 = vmatprep.subr.mxu1 %v393_v9  ;;  %v388_v16 = vld [vmem:[%s4826_s1] sm:$0xff]  ;;  %v3479_v18 = vld [vmem:[%s383_s12 + $0x8] sm:$0xff]  ;;  %v3481_v19 = vld [vmem:[%s383_s12 + $0x10] sm:$0xff]  ;;  %vm1920_vm8 = vcmask 916480   ;;  %vm2529_vm9 = vcmask 73728  }
  0x1b   : > { %462 = vmatpush1.msra.mxu0 %v2607_v5  ;;  %3204 = vmatpush1.msra.mxu1 %v392_v10  ;;  %v384_v17 = vld [vmem:[%s383_s12] sm:$0xff]  ;;  %v411_v21 = vrot.slane %v3479_v18, 1  ;;  %v413_v22 = vrot.slane %v3481_v19, 1  ;;  %v387_v23 = vld [vmem:[%s383_s12 + $0x18] sm:$0x3f]  ;;  %v2630_v30 = vld [vmem:[%s4826_s1 + $0xa8] sm:$0xff] }
  0x1c   : > { %463 = vmatprep.subr.mxu0 %v2606_v11  ;;  %3201 = vmatprep.subr.mxu1 %v391_v12  ;;  %v410_v20 = vrot.slane %v384_v17, 1  ;;  %v415_v26 = vrot.slane %v387_v23, 1  ;;  %v2632_v28 = vld [vmem:[%s4826_s1 + $0xb8] sm:$0x3f]  ;;  %v2631_v29 = vld [vmem:[%s4826_s1 + $0xb0] sm:$0x3f] }
  0x1d   : > { %464 = vmatpush1.msra.mxu0 %v2605_v13  ;;  %3205 = vmatpush1.msra.mxu1 %v390_v14  ;;  %v414_v25 = vsel %vm409_vm1, %v411_v21, %v413_v22  ;;  %v2629_v31 = vld [vmem:[%s4826_s1 + $0xa0] sm:$0xff]  ;;  %v634_v32 = vrot.slane %v384_v17, 2  ;;  %v635_v33 = vrot.slane %v3479_v18, 2  ;;  %v2628_v34 = vld [vmem:[%s4826_s1 + $0x98] sm:$0xff]  ;;  %v2627_v35 = vld [vmem:[%s4826_s1 + $0x90] sm:$0xff]  ;;  %v637_v39 = vrot.slane %v3481_v19, 2 }
  0x1e   : > { %2619 = vmatprep.subr.msk.mxu0 %vm426_vm0, %v395_v7  ;;  %3202 = vmatprep.subr.mxu1 %v389_v15  ;;  %v412_v24 = vsel %vm409_vm1, %v410_v20, %v411_v21  ;;  %v416_v27 = vsel %vm409_vm1, %v413_v22, %v415_v26  ;;  %v2626_v36 = vld [vmem:[%s4826_s1 + $0x88] sm:$0xff]  ;;  %v2625_v37 = vld [vmem:[%s4826_s1 + $0x80] sm:$0xff]  ;;  %v639_v41 = vrot.slane %v387_v23, 2  ;;  %v978_v43 = vld [vmem:[%s4829_s4 + $0x78] sm:$0xff]  ;;  %s2873_s12 = sshll.u32 %s3394_s21, 4  ;;  %s3312_s21 = smov [#allocation2]  }
  0x1f   : > { %3206 = vmatpush1.msra.mxu1 %v388_v16  ;;  %612 = vmatprep.mubr.f32.mxu1 %v3310_v6  ;;  %v636_v38 = vsel %vm426_vm0, %v634_v32, %v635_v33  ;;  %v638_v40 = vsel %vm426_vm0, %v635_v33, %v637_v39  ;;  %v977_v44 = vld [vmem:[%s4829_s4 + $0x70] sm:$0xff]  ;;  %v976_v45 = vld [vmem:[%s4829_s4 + $0x68] sm:$0xff]  ;;  %v975_v46 = vld [vmem:[%s4829_s4 + $0x60] sm:$0xff]  ;;  %s4790_s14 = scalar_lea.hbm %s4836_s11, %s2873_s12  ;;  %s3252_s22 = sshll.u32 %s3312_s21, 4  ;;  %s3253_s22 = int_to_ptr.vmem [resolvable:$false] %s3252_s22 }
  0x20   : > { %2615 = vmatmul.mubr.msk.f32.vlgmr.msra.gmra.mxu0 %vm417_vm2, %v412_v24  ;;  %2623 = vmatmul.mubr.msk.f32.vlgmr.msra.gmra.mxu1 %vm417_vm2, %v3481_v19  ;;  %v640_v42 = vsel %vm426_vm0, %v637_v39, %v639_v41  ;;  %v974_v47 = vld [vmem:[%s4829_s4 + $0x58] sm:$0xff]  ;;  %v973_v48 = vld [vmem:[%s4829_s4 + $0x50] sm:$0xff]  ;;  %v972_v49 = vld [vmem:[%s4829_s4 + $0x48] sm:$0xff]  ;;  %s3254_s24 = scalar_lea.vmem %s3253_s22, 32  ;;  %p3255_p0 = scmp.lt.s32.totalorder %s2545_s13, %s3253_s22 }
  0x21   : > { %503 = vmatprep.mubr.f32.mxu0 %v3310_v6  ;;  %2620 = vmatpush1.msk.msra.mxu0 %vm426_vm0, %v394_v8  ;;  %v971_v50 = vld [vmem:[%s4829_s4 + $0x40] sm:$0xff]  ;;  %v970_v51 = vld [vmem:[%s4829_s4 + $0x38] sm:$0xff]  ;;  %v969_v52 = vld [vmem:[%s4829_s4 + $0x30] sm:$0xff]  ;;  %p3256_p1 = scmp.lt.s32.totalorder %s3254_s24, %s3248_s16 }
  0x22   : > { %562 = vmatprep.subr.mxu0 %v393_v9  ;;  %618 = vmatprep.mubr.f32.mxu1 %v3310_v6  ;;  %v968_v53 = vld [vmem:[%s4829_s4 + $0x28] sm:$0xff]  ;;  %v967_v54 = vld [vmem:[%s4829_s4 + $0x20] sm:$0xff]  ;;  %v966_v55 = vld [vmem:[%s4829_s4 + $0x18] sm:$0xff] }
  0x23   : > { %563 = vmatpush1.msra.mxu0 %v392_v10  ;;  %v965_v56 = vld [vmem:[%s4829_s4 + $0x10] sm:$0xff]  ;;  %v964_v57 = vld [vmem:[%s4829_s4 + $0x8] sm:$0xff]  ;;  %v963_v58 = vld [vmem:[%s4829_s4] sm:$0xff]  ;;  %p3257_p2 = por %p3256_p1, %p3255_p0 }
  0x24   : > { %2616 = vmatmul.mubr.msk.f32.gmra.mxu0 %vm417_vm2, %v414_v25  ;;  %564 = vmatprep.subr.mxu0 %v391_v12  ;;  %v990_v59 = vld [vmem:[%s4829_s4 + $0xd8] sm:$0xff]  ;;  %v989_v60 = vld [vmem:[%s4829_s4 + $0xd0] sm:$0xff]  ;;  %v988_v61 = vld [vmem:[%s4829_s4 + $0xc8] sm:$0xff] }
  0x25   : > { %509 = vmatprep.mubr.f32.mxu0 %v3310_v6  ;;  %2624 = vmatmul.mubr.msk.f32.gmra.mxu1 %vm417_vm2, %v387_v23  ;;  %v987_v62 = vld [vmem:[%s4829_s4 + $0xc0] sm:$0xff]  ;;  %v986_v63 = vld [vmem:[%s4829_s4 + $0xb8] sm:$0xff]  ;;  %p3258_p3 = pnand %p3257_p2, %p3251_p13 }
  0x26   : > { %565 = vmatpush1.msra.mxu0 %v390_v14  ;;  %860 = vmatprep.mubr.f32.mxu1 %v3310_v6 }
  0x27   : > { %566 = vmatprep.subr.mxu0 %v389_v15 }
  0x28   : > { %2617 = vmatmul.mubr.msk.f32.gmra.mxu0 %vm417_vm2, %v416_v27 }
  0x29   : > { %515 = vmatprep.mubr.f32.mxu0 %v3310_v6  ;;  %567 = vmatpush1.msra.mxu0 %v388_v16  ;;  %v754_v16 = vlaneseq }
  0x2a   : > { %2633 = vmatprep.subr.msk.mxu0 %vm426_vm0, %v2632_v28  ;;  %v752_v28 = vld [vmem:[%s4827_s2] sm:$0x3] }
  0x2b   : > { %v3632_v20 = vshrl.u32 %v754_v16, 7  ;;  %v2655_v16 = vld [vmem:[%s4829_s4 + $0x100] sm:$0xff] }
  0x2c   : > { %2618 = vmatmul.mubr.msk.f32.gmra.mxu0 %vm417_vm2, %v415_v26 }
  0x2d   : > { %600 = vmatprep.mubr.f32.mxu0 %v3310_v6  ;;  %v756_v24 = vsub.s32 0, %v3632_v20 }
  0x30   : > { %2621 = vmatmul.mubr.msk.f32.vlgmr.msra.gmra.mxu0 %vm417_vm2, %v384_v17 }
  0x31   : > { %2634 = vmatpush1.msk.msra.mxu0 %vm426_vm0, %v2631_v29  ;;  %606 = vmatprep.mubr.f32.mxu0 %v3310_v6  ;;  %v760_v29 = vsub.s32 1, %v3632_v20  ;;  %v2748_v20 = vld [vmem:[%s4832_s7 + $0x8] sm:$0x7f] }
  0x32   : > { %681 = vmatprep.subr.mxu0 %v2630_v30 }
  0x33   : > { %682 = vmatpush1.msra.mxu0 %v2629_v31 }
  0x34   : > { %2622 = vmatmul.mubr.msk.f32.gmra.mxu0 %vm417_vm2, %v3479_v18  ;;  %683 = vmatprep.subr.mxu0 %v2628_v34 }
  0x35   : > { %684 = vmatpush1.msra.mxu0 %v2627_v35  ;;  %719 = vmatprep.mubr.f32.mxu0 %v3310_v6 }
  0x36   : > { %685 = vmatprep.subr.mxu0 %v2626_v36 }
  0x37   : > { %686 = vmatpush1.msra.mxu0 %v2625_v37  ;;  %v757_v37 = vrot.slane %v752_v28, %v756_v24 }
  0x38   : > { %2635 = vmatmul.mubr.msk.f32.vlgmr.msra.gmra.mxu0 %vm417_vm2, %v636_v38  ;;  %998 = vmatprep.subr.mxu0 %v3310_v6 }
  0x39   : > { %725 = vmatprep.mubr.f32.mxu0 %v3310_v6  ;;  %999 = vmatpush1.msra.mxu0 %v978_v43 }
  0x3a   : > { %1000 = vmatprep.subr.mxu0 %v3310_v6 }
  0x3b   : > { %1001 = vmatpush1.msra.mxu0 %v977_v44 }
  0x3c   : > { %2636 = vmatmul.mubr.msk.f32.gmra.mxu0 %vm417_vm2, %v638_v40  ;;  %1002 = vmatprep.subr.mxu0 %v3310_v6 }
  0x3d   : > { %731 = vmatprep.mubr.f32.mxu0 %v3310_v6  ;;  %1003 = vmatpush1.msra.mxu0 %v976_v45 }
  0x3e   : > { %1004 = vmatprep.subr.mxu0 %v3310_v6 }
  0x3f   : > { %1005 = vmatpush1.msra.mxu0 %v975_v46 }
  0x40   : > { %2637 = vmatmul.mubr.msk.f32.gmra.mxu0 %vm417_vm2, %v640_v42  ;;  %1006 = vmatprep.subr.mxu0 %v3310_v6 }
  0x41   : > { %737 = vmatprep.mubr.f32.mxu0 %v3310_v6  ;;  %1007 = vmatpush1.msra.mxu0 %v974_v47 }
  0x42   : > { %1008 = vmatprep.subr.mxu0 %v3310_v6 }
  0x43   : > { %1009 = vmatpush1.msra.mxu0 %v973_v48 }
  0x44   : > { %2638 = vmatmul.mubr.msk.f32.gmra.mxu0 %vm417_vm2, %v639_v41  ;;  %1010 = vmatprep.subr.mxu0 %v3310_v6  ;;  %v761_v41 = vrot.slane %v752_v28, %v760_v29  ;;  %v985_v28 = vld [vmem:[%s4829_s4 + $0xb0] sm:$0xff] }
  0x45   : > { %1011 = vmatpush1.msra.mxu0 %v972_v49 }
  0x46   : > { %1012 = vmatprep.subr.mxu0 %v3310_v6 }
  0x47   : > { %1013 = vmatpush1.msra.mxu0 %v971_v50 }
  0x48   : > { %1014 = vmatprep.subr.mxu0 %v3310_v6 }
  0x49   : > { %1015 = vmatpush1.msra.mxu0 %v970_v51 }
  0x4a   : > { %1016 = vmatprep.subr.mxu0 %v3310_v6 }
  0x4b   : > { %1017 = vmatpush1.msra.mxu0 %v969_v52 }
  0x4c   : > { %1018 = vmatprep.subr.mxu0 %v3310_v6 }
  0x4d   : > { %1019 = vmatpush1.msra.mxu0 %v968_v53 }
  0x4e   : > { %1020 = vmatprep.subr.mxu0 %v3310_v6 }
  0x4f   : > { %1021 = vmatpush1.msra.mxu0 %v967_v54 }
  0x50   : > { %1022 = vmatprep.subr.mxu0 %v3310_v6 }
  0x51   : > { %1023 = vmatpush1.msra.mxu0 %v966_v55 }
  0x52   : > { %1024 = vmatprep.subr.mxu0 %v3310_v6 }
  0x53   : > { %1025 = vmatpush1.msra.mxu0 %v965_v56 }
  0x54   : > { %1026 = vmatprep.subr.mxu0 %v3310_v6 }
  0x55   : > { %1027 = vmatpush1.msra.mxu0 %v964_v57 }
  0x56   : > { %1028 = vmatprep.subr.mxu0 %v3310_v6 }
  0x57   : > { %1029 = vmatpush1.msra.mxu0 %v963_v58 }
  0x58   : > { %1038 = vmatprep.subr.mxu0 %v3310_v6 }
  0x59   : > { %1039 = vmatpush2.msra.mxu0 %v990_v59 }
  0x5a   : > { %1040 = vmatprep.subr.mxu0 %v3310_v6 }
  0x5b   : > { %1041 = vmatpush2.msra.mxu0 %v989_v60 }
  0x5c   : > { %1042 = vmatprep.subr.mxu0 %v3310_v6 }
  0x5d   : > { %1043 = vmatpush2.msra.mxu0 %v988_v61 }
  0x5e   : > { %1044 = vmatprep.subr.mxu0 %v3310_v6 }
  0x5f   : > { %1045 = vmatpush2.msra.mxu0 %v987_v62 }
  0x60   : > { %1046 = vmatprep.subr.mxu0 %v3310_v6 }
  0x61   : > { %1047 = vmatpush2.msra.mxu0 %v986_v63 }
  0x62   : > { %1048 = vmatprep.subr.mxu0 %v3310_v6 }
  0x63   : > { %1049 = vmatpush2.msra.mxu0 %v985_v28  ;;  %v1193_v28 = vld [vmem:[%s4830_s5 + $0x70] sm:$0xff] }
  0x64   : > { %1050 = vmatprep.subr.mxu0 %v3310_v6 }
  0xe0   : > { %v499_v0 = vpop.f32.mrf.mxu0  ;;  %v614_v12 = vpop.f32.mrf.mxu1 }
  0xe2   : > { %v501_v1 = vpop.f32.mrf.mxu0  ;;  %v616_v15 = vpop.f32.mrf.mxu1 }
  0xe4   : > { %v505_v2 = vpop.f32.mrf.mxu0 }
  0xe5   : > { %v620_v19 = vpop.f32.mrf.mxu1 }
  0xe6   : > { %v507_v3 = vpop.f32.mrf.mxu0 }
  0xe7   : > { %v622_v23 = vpop.f32.mrf.mxu1 }
  0xe8   : > { %v511_v4 = vpop.f32.mrf.mxu0 }
  0xe9   : > { %v615_v30 = vadd.f32 %v614_v12, %v511_v4  ;;  %v2665_v4 = vld [vmem:[%s4829_s4 + $0x150] sm:$0xff]  ;;  %v2659_v12 = vld [vmem:[%s4829_s4 + $0x120] sm:$0xff] }
  0xea   : > { %v513_v5 = vpop.f32.mrf.mxu0 }
  0xeb   : > { %v617_v26 = vadd.f32 %v616_v15, %v513_v5  ;;  %v2644_v5 = vld [vmem:[%s4828_s3 + $0x18] sm:$0xff]  ;;  %v2656_v15 = vld [vmem:[%s4829_s4 + $0x108] sm:$0xff] }
  0xec   : > { %v517_v7 = vpop.f32.mrf.mxu0 }
  0xed   : > { %v621_v27 = vadd.f32 %v620_v19, %v517_v7  ;;  %v2664_v7 = vld [vmem:[%s4829_s4 + $0x148] sm:$0xff] }
  0xee   : > { %v519_v8 = vpop.f32.mrf.mxu0  ;;  %v2652_v19 = vld [vmem:[%s4829_s4 + $0xe8] sm:$0xff] }
  0xef   : > { %v623_v32 = vadd.f32 %v622_v23, %v519_v8  ;;  %v2663_v8 = vld [vmem:[%s4829_s4 + $0x140] sm:$0xff]  ;;  %v2677_v23 = vld [vmem:[%s4829_s4 + $0x1b0] sm:$0xff] }
  0xf0   : > { %v602_v9 = vpop.f32.mrf.mxu0 }
  0xf1   : > { %v603_v44 = vadd.f32 %v602_v9, %v499_v0  ;;  %v780_v0 = vld [vmem:[%s4828_s3] sm:$0xff]  ;;  %v2662_v9 = vld [vmem:[%s4829_s4 + $0x138] sm:$0xff] }
  0xf2   : > { %v604_v10 = vpop.f32.mrf.mxu0 }
  0xf3   : > { %v605_v40 = vadd.f32 %v604_v10, %v501_v1  ;;  %v781_v1 = vld [vmem:[%s4828_s3 + $0x8] sm:$0xff]  ;;  %v2661_v10 = vld [vmem:[%s4829_s4 + $0x130] sm:$0xff] }
  0xf4   : > { %v608_v11 = vpop.f32.mrf.mxu0 }
  0xf5   : > { %v609_v36 = vadd.f32 %v608_v11, %v505_v2  ;;  %v2643_v2 = vld [vmem:[%s4828_s3 + $0x10] sm:$0xff]  ;;  %v2660_v11 = vld [vmem:[%s4829_s4 + $0x128] sm:$0xff] }
  0xf6   : > { %v610_v13 = vpop.f32.mrf.mxu0 }
  0xf7   : > { %v611_v33 = vadd.f32 %v610_v13, %v507_v3  ;;  %v2666_v3 = vld [vmem:[%s4829_s4 + $0x158] sm:$0xff] }
  0xf8   : > { %v721_v14 = vpop.f32.mrf.mxu0  ;;  %v2658_v13 = vld [vmem:[%s4829_s4 + $0x118] sm:$0xff] }
  0xf9   : > { %v744_v50 = vadd.f32 %v721_v14, %v603_v44  ;;  %v2657_v14 = vld [vmem:[%s4829_s4 + $0x110] sm:$0xff]  ;;  %v2712_v44 = vld [vmem:[%s4830_s5 + $0x1f8] sm:$0xff] }
  0xfa   : > { %v723_v17 = vpop.f32.mrf.mxu0 }
  0xfb   : > { %v745_v47 = vadd.f32 %v723_v17, %v605_v40  ;;  %v764_v58 = vadd.f32 %v757_v37, %v744_v50  ;;  %v2654_v17 = vld [vmem:[%s4829_s4 + $0xf8] sm:$0xff]  ;;  %v2668_v40 = vld [vmem:[%s4829_s4 + $0x168] sm:$0xff] }
  0xfc   : > { %v727_v18 = vpop.f32.mrf.mxu0 }
  0xfd   : > { %v746_v45 = vadd.f32 %v727_v18, %v609_v36  ;;  %v765_v56 = vadd.f32 %v761_v41, %v745_v47  ;;  %v772_v63 = vmax.f32 %v764_v58, 0.0  ;;  %v2653_v18 = vld [vmem:[%s4829_s4 + $0xf0] sm:$0xff]  ;;  %v2670_v36 = vld [vmem:[%s4829_s4 + $0x178] sm:$0xff] }
  0xfe   : > { %v729_v21 = vpop.f32.mrf.mxu0 }
  0xff   : > { %v747_v42 = vadd.f32 %v729_v21, %v611_v33  ;;  %v766_v54 = vadd.f32 %v757_v37, %v746_v45  ;;  %v773_v62 = vmax.f32 %v765_v56, 0.0  ;;  %v2651_v21 = vld [vmem:[%s4829_s4 + $0xe0] sm:$0xff]  ;;  %v1208_v56 = vld [vmem:[%s4830_s5 + $0xe8] sm:$0xff] }
 0x100   : > { %v733_v22 = vpop.f32.mrf.mxu0  ;;  %v983_v33 = vld [vmem:[%s4829_s4 + $0xa0] sm:$0xff] }
 0x101   : > { %v748_v38 = vadd.f32 %v733_v22, %v615_v30  ;;  %v767_v52 = vadd.f32 %v761_v41, %v747_v42  ;;  %v774_v61 = vmax.f32 %v766_v54, 0.0  ;;  %v2678_v22 = vld [vmem:[%s4829_s4 + $0x1b8] sm:$0xff]  ;;  %v2673_v30 = vld [vmem:[%s4829_s4 + $0x190] sm:$0xff]  ;;  %v2667_v42 = vld [vmem:[%s4829_s4 + $0x160] sm:$0xff] }
 0x102   : > { %v735_v25 = vpop.f32.mrf.mxu0  ;;  %v1209_v54 = vld [vmem:[%s4830_s5 + $0xf0] sm:$0xff] }
 0x103   : > { %v749_v34 = vadd.f32 %v735_v25, %v617_v26  ;;  %v768_v51 = vadd.f32 %v757_v37, %v748_v38  ;;  %v775_v60 = vmax.f32 %v767_v52, 0.0  ;;  %v2676_v25 = vld [vmem:[%s4829_s4 + $0x1a8] sm:$0xff]  ;;  %v2675_v26 = vld [vmem:[%s4829_s4 + $0x1a0] sm:$0xff]  ;;  %v2669_v38 = vld [vmem:[%s4829_s4 + $0x170] sm:$0xff] }
 0x104   : > { %v739_v31 = vpop.f32.mrf.mxu0 }
 0x105   : > { %v750_v35 = vadd.f32 %v739_v31, %v621_v27  ;;  %v769_v48 = vadd.f32 %v761_v41, %v749_v34  ;;  %v776_v59 = vmax.f32 %v768_v51, 0.0  ;;  %v2674_v27 = vld [vmem:[%s4829_s4 + $0x198] sm:$0xff]  ;;  %v984_v31 = vld [vmem:[%s4829_s4 + $0xa8] sm:$0xff]  ;;  %v2671_v34 = vld [vmem:[%s4829_s4 + $0x180] sm:$0xff] }
 0x106   : > { %v741_v39 = vpop.f32.mrf.mxu0  ;;  %1051 = vmatpush2.msra.mxu0 %v984_v31  ;;  %v1192_v31 = vld [vmem:[%s4830_s5 + $0x68] sm:$0xff] }
 0x107   : > { %v751_v43 = vadd.f32 %v741_v39, %v623_v32  ;;  %v770_v46 = vadd.f32 %v757_v37, %v750_v35  ;;  %v777_v57 = vmax.f32 %v769_v48, 0.0  ;;  %v2672_v32 = vld [vmem:[%s4829_s4 + $0x188] sm:$0xff]  ;;  %1052 = vmatprep.subr.mxu0 %v3310_v6  ;;  %v982_v35 = vld [vmem:[%s4829_s4 + $0x98] sm:$0xff]  ;;  %v981_v37 = vld [vmem:[%s4829_s4 + $0x90] sm:$0xff] }
 0x108   : > { %1053 = vmatpush2.msra.mxu0 %v983_v33  ;;  %v980_v39 = vld [vmem:[%s4829_s4 + $0x88] sm:$0xff]  ;;  %v1191_v33 = vld [vmem:[%s4830_s5 + $0x60] sm:$0xff] }
 0x109   : > { %v771_v49 = vadd.f32 %v761_v41, %v751_v43  ;;  %v778_v55 = vmax.f32 %v770_v46, 0.0  ;;  %1054 = vmatprep.subr.mxu0 %v3310_v6  ;;  %v979_v41 = vld [vmem:[%s4829_s4 + $0x80] sm:$0xff]  ;;  %v1210_v43 = vld [vmem:[%s4830_s5 + $0xf8] sm:$0xff] }
 0x10a   : > { %1055 = vmatpush2.msra.mxu0 %v982_v35  ;;  %v1190_v35 = vld [vmem:[%s4830_s5 + $0x58] sm:$0xff] }
 0x10b   : > { %v779_v53 = vmax.f32 %v771_v49, 0.0  ;;  %1056 = vmatprep.subr.mxu0 %v3310_v6 }
 0x10c   : > { %1057 = vmatpush2.msra.mxu0 %v981_v37  ;;  %v1189_v37 = vld [vmem:[%s4830_s5 + $0x50] sm:$0xff] }
 0x10d   : > { %2639 = vmatprep.subr.msk.mxu1 %vm789_vm3, %v779_v53  ;;  %1058 = vmatprep.subr.mxu0 %v3310_v6 }
 0x10e   : > { %2640 = vmatpush1.msk.msra.mxu1 %vm789_vm3, %v778_v55  ;;  %1059 = vmatpush2.msra.mxu0 %v980_v39  ;;  %v1188_v39 = vld [vmem:[%s4830_s5 + $0x48] sm:$0xff] }
 0x10f   : > { %822 = vmatprep.subr.mxu1 %v777_v57  ;;  %1060 = vmatprep.subr.mxu0 %v3310_v6 }
 0x110   : > { %823 = vmatpush1.msra.mxu1 %v776_v59  ;;  %1061 = vmatpush2.msra.mxu0 %v979_v41  ;;  %v1187_v41 = vld [vmem:[%s4830_s5 + $0x40] sm:$0xff] }
 0x111   : > { %824 = vmatprep.subr.mxu1 %v775_v60  ;;  %1251 = vmatprep.subr.mxu0 %v2712_v44  ;;  %v1184_v44 = vld [vmem:[%s4830_s5 + $0x28] sm:$0xff] }
 0x112   : > { %825 = vmatpush1.msra.mxu1 %v774_v61 }
 0x113   : > { %826 = vmatprep.subr.mxu1 %v773_v62 }
 0x114   : > { %827 = vmatpush1.msra.mxu1 %v772_v63 }
 0x115   : > { %2641 = vmatmul.mubr.msk.f32.vlgmr.msra.gmra.mxu1 %vm782_vm4, %v780_v0  ;;  %2645 = vmatprep.subr.msk.mxu1 %vm789_vm3, %v779_v53  ;;  %v2708_v0 = vld [vmem:[%s4830_s5 + $0x1d8] sm:$0xff] }
 0x116   : > { %2646 = vmatpush1.msk.msra.mxu1 %vm789_vm3, %v778_v55  ;;  %866 = vmatprep.mubr.f32.mxu1 %v3310_v6  ;;  %v2711_v55 = vld [vmem:[%s4830_s5 + $0x1f0] sm:$0xff] }
 0x117   : > { %908 = vmatprep.subr.mxu1 %v777_v57  ;;  %v2710_v57 = vld [vmem:[%s4830_s5 + $0x1e8] sm:$0xff] }
 0x118   : > { %909 = vmatpush1.msra.mxu1 %v776_v59 }
 0x119   : > { %2642 = vmatmul.mubr.msk.f32.gmra.mxu1 %vm782_vm4, %v781_v1  ;;  %910 = vmatprep.subr.mxu1 %v775_v60  ;;  %v1205_v1 = vld [vmem:[%s4830_s5 + $0xd0] sm:$0xff] }
 0x11a   : > { %911 = vmatpush1.msra.mxu1 %v774_v61  ;;  %946 = vmatprep.mubr.f32.mxu1 %v3310_v6  ;;  %v1207_v61 = vld [vmem:[%s4830_s5 + $0xe0] sm:$0xff] }
 0x11b   : > { %912 = vmatprep.subr.mxu1 %v773_v62  ;;  %v2709_v62 = vld [vmem:[%s4830_s5 + $0x1e0] sm:$0xff] }
 0x11c   : > { %913 = vmatpush1.msra.mxu1 %v772_v63  ;;  %v1206_v63 = vld [vmem:[%s4830_s5 + $0xd8] sm:$0xff] }
 0x11d   : > { %2647 = vmatmul.mubr.msk.f32.vlgmr.msra.gmra.mxu1 %vm782_vm4, %v2643_v2  ;;  %1102 = vmatprep.subr.mxu1 %v3310_v6  ;;  %v2707_v2 = vld [vmem:[%s4830_s5 + $0x1d0] sm:$0xff] }
 0x11e   : > { %952 = vmatprep.mubr.f32.mxu1 %v3310_v6  ;;  %1103 = vmatpush1.msra.mxu1 %v2666_v3  ;;  %v1204_v3 = vld [vmem:[%s4830_s5 + $0xc8] sm:$0xff] }
 0x11f   : > { %1104 = vmatprep.subr.mxu1 %v3310_v6 }
 0x120   : > { %1105 = vmatpush1.msra.mxu1 %v2665_v4  ;;  %v2706_v4 = vld [vmem:[%s4830_s5 + $0x1c8] sm:$0xff] }
 0x121   : > { %2648 = vmatmul.mubr.msk.f32.gmra.mxu1 %vm782_vm4, %v2644_v5  ;;  %1106 = vmatprep.subr.mxu1 %v3310_v6  ;;  %v1203_v5 = vld [vmem:[%s4830_s5 + $0xc0] sm:$0xff] }
 0x122   : > { %1107 = vmatpush1.msra.mxu1 %v2664_v7  ;;  %v2705_v7 = vld [vmem:[%s4830_s5 + $0x1c0] sm:$0xff] }
 0x123   : > { %1108 = vmatprep.subr.mxu1 %v3310_v6 }
 0x124   : > { %1109 = vmatpush1.msra.mxu1 %v2663_v8  ;;  %v1202_v8 = vld [vmem:[%s4830_s5 + $0xb8] sm:$0xff] }
 0x125   : > { %1110 = vmatprep.subr.mxu1 %v3310_v6 }
 0x126   : > { %1111 = vmatpush1.msra.mxu1 %v2662_v9  ;;  %v2704_v9 = vld [vmem:[%s4830_s5 + $0x1b8] sm:$0xff] }
 0x127   : > { %1112 = vmatprep.subr.mxu1 %v3310_v6 }
 0x128   : > { %1113 = vmatpush1.msra.mxu1 %v2661_v10  ;;  %v1201_v10 = vld [vmem:[%s4830_s5 + $0xb0] sm:$0xff] }
 0x129   : > { %1114 = vmatprep.subr.mxu1 %v3310_v6 }
 0x12a   : > { %1115 = vmatpush1.msra.mxu1 %v2660_v11  ;;  %v2703_v11 = vld [vmem:[%s4830_s5 + $0x1b0] sm:$0xff] }
 0x12b   : > { %1116 = vmatprep.subr.mxu1 %v3310_v6 }
 0x12c   : > { %1117 = vmatpush1.msra.mxu1 %v2659_v12  ;;  %v1200_v12 = vld [vmem:[%s4830_s5 + $0xa8] sm:$0xff] }
 0x12d   : > { %1118 = vmatprep.subr.mxu1 %v3310_v6 }
 0x12e   : > { %1119 = vmatpush1.msra.mxu1 %v2658_v13  ;;  %v2702_v13 = vld [vmem:[%s4830_s5 + $0x1a8] sm:$0xff] }
 0x12f   : > { %1120 = vmatprep.subr.mxu1 %v3310_v6 }
 0x130   : > { %1121 = vmatpush1.msra.mxu1 %v2657_v14  ;;  %v1199_v14 = vld [vmem:[%s4830_s5 + $0xa0] sm:$0xff] }
 0x131   : > { %1122 = vmatprep.subr.mxu1 %v3310_v6 }
 0x132   : > { %1123 = vmatpush1.msra.mxu1 %v2656_v15  ;;  %v2701_v15 = vld [vmem:[%s4830_s5 + $0x1a0] sm:$0xff] }
 0x133   : > { %1124 = vmatprep.subr.mxu1 %v3310_v6 }
 0x134   : > { %1125 = vmatpush1.msra.mxu1 %v2655_v16  ;;  %v1198_v16 = vld [vmem:[%s4830_s5 + $0x98] sm:$0xff] }
 0x135   : > { %1126 = vmatprep.subr.mxu1 %v3310_v6 }
 0x136   : > { %1127 = vmatpush1.msra.mxu1 %v2654_v17  ;;  %v2700_v17 = vld [vmem:[%s4830_s5 + $0x198] sm:$0xff] }
 0x137   : > { %1128 = vmatprep.subr.mxu1 %v3310_v6 }
 0x138   : > { %1129 = vmatpush1.msra.mxu1 %v2653_v18  ;;  %v1197_v18 = vld [vmem:[%s4830_s5 + $0x90] sm:$0xff] }
 0x139   : > { %1130 = vmatprep.subr.mxu1 %v3310_v6 }
 0x13a   : > { %1131 = vmatpush1.msra.mxu1 %v2652_v19  ;;  %v2699_v19 = vld [vmem:[%s4830_s5 + $0x190] sm:$0xff] }
 0x13b   : > { %1132 = vmatprep.subr.mxu1 %v3310_v6 }
 0x13c   : > { %1133 = vmatpush1.msra.mxu1 %v2651_v21  ;;  %v1196_v21 = vld [vmem:[%s4830_s5 + $0x88] sm:$0xff] }
 0x13d   : > { %1142 = vmatprep.subr.mxu1 %v3310_v6 }
 0x13e   : > { %1143 = vmatpush2.msra.mxu1 %v2678_v22  ;;  %v2698_v22 = vld [vmem:[%s4830_s5 + $0x188] sm:$0xff] }
 0x13f   : > { %1144 = vmatprep.subr.mxu1 %v3310_v6 }
 0x140   : > { %1145 = vmatpush2.msra.mxu1 %v2677_v23  ;;  %v1195_v23 = vld [vmem:[%s4830_s5 + $0x80] sm:$0xff] }
 0x141   : > { %1146 = vmatprep.subr.mxu1 %v3310_v6 }
 0x142   : > { %1147 = vmatpush2.msra.mxu1 %v2676_v25  ;;  %v2697_v25 = vld [vmem:[%s4830_s5 + $0x180] sm:$0xff] }
 0x143   : > { %1148 = vmatprep.subr.mxu1 %v3310_v6 }
 0x144   : > { %1149 = vmatpush2.msra.mxu1 %v2675_v26  ;;  %v1194_v26 = vld [vmem:[%s4830_s5 + $0x78] sm:$0xff] }
 0x145   : > { %1150 = vmatprep.subr.mxu1 %v3310_v6 }
 0x146   : > { %1151 = vmatpush2.msra.mxu1 %v2674_v27  ;;  %v2696_v27 = vld [vmem:[%s4830_s5 + $0x178] sm:$0xff] }
 0x147   : > { %1152 = vmatprep.subr.mxu1 %v3310_v6 }
 0x148   : > { %1153 = vmatpush2.msra.mxu1 %v2673_v30  ;;  %v2695_v30 = vld [vmem:[%s4830_s5 + $0x170] sm:$0xff] }
 0x149   : > { %1154 = vmatprep.subr.mxu1 %v3310_v6 }
 0x14a   : > { %1155 = vmatpush2.msra.mxu1 %v2672_v32  ;;  %v2694_v32 = vld [vmem:[%s4830_s5 + $0x168] sm:$0xff] }
 0x14b   : > { %1156 = vmatprep.subr.mxu1 %v3310_v6 }
 0x14c   : > { %1157 = vmatpush2.msra.mxu1 %v2671_v34  ;;  %v2693_v34 = vld [vmem:[%s4830_s5 + $0x160] sm:$0xff] }
 0x14d   : > { %1158 = vmatprep.subr.mxu1 %v3310_v6 }
 0x14e   : > { %1159 = vmatpush2.msra.mxu1 %v2670_v36  ;;  %v2692_v36 = vld [vmem:[%s4830_s5 + $0x158] sm:$0xff] }
 0x14f   : > { %1160 = vmatprep.subr.mxu1 %v3310_v6 }
 0x150   : > { %1161 = vmatpush2.msra.mxu1 %v2669_v38  ;;  %v2691_v38 = vld [vmem:[%s4830_s5 + $0x150] sm:$0xff] }
 0x151   : > { %1162 = vmatprep.subr.mxu1 %v3310_v6 }
 0x152   : > { %1163 = vmatpush2.msra.mxu1 %v2668_v40  ;;  %v2690_v40 = vld [vmem:[%s4830_s5 + $0x148] sm:$0xff] }
 0x153   : > { %1164 = vmatprep.subr.mxu1 %v3310_v6 }
 0x154   : > { %1165 = vmatpush2.msra.mxu1 %v2667_v42  ;;  %v1186_v42 = vld [vmem:[%s4830_s5 + $0x38] sm:$0xff] }
 0x155   : > { %1328 = vmatprep.subr.mxu1 %v1210_v43  ;;  %v1185_v43 = vld [vmem:[%s4830_s5 + $0x30] sm:$0xff] }
 0x1d5   : > { %v862_v45 = vpop.f32.mrf.mxu1 }
 0x1d7   : > { %v864_v46 = vpop.f32.mrf.mxu1 }
 0x1d9   : > { %v868_v47 = vpop.f32.mrf.mxu1 }
 0x1db   : > { %v870_v48 = vpop.f32.mrf.mxu1 }
 0x1dd   : > { %v948_v49 = vpop.f32.mrf.mxu1 }
 0x1de   : > { %v959_v52 = vmax.f32 %v862_v45, %v948_v49  ;;  %v1183_v45 = vld [vmem:[%s4830_s5 + $0x20] sm:$0xff]  ;;  %v2688_v49 = vld [vmem:[%s4830_s5 + $0x138] sm:$0xff] }
 0x1df   : > { %v950_v50 = vpop.f32.mrf.mxu1 }
 0x1e0   : > { %v960_v51 = vmax.f32 %v864_v46, %v950_v50  ;;  %v1182_v46 = vld [vmem:[%s4830_s5 + $0x18] sm:$0xff]  ;;  %v1180_v50 = vld [vmem:[%s4830_s5 + $0x8] sm:$0xff] }
 0x1e1   : > { %v954_v53 = vpop.f32.mrf.mxu1 }
 0x1e2   : > { %2649 = vmatprep.mubr.msk.f32.mxu0 %vm991_vm5, %v960_v51  ;;  %2679 = vmatprep.mubr.msk.f32.mxu1 %vm991_vm5, %v960_v51  ;;  %v961_v60 = vmax.f32 %v868_v47, %v954_v53  ;;  %v2689_v47 = vld [vmem:[%s4830_s5 + $0x140] sm:$0xff]  ;;  %v2687_v51 = vld [vmem:[%s4830_s5 + $0x130] sm:$0xff]  ;;  %v2686_v53 = vld [vmem:[%s4830_s5 + $0x128] sm:$0xff] }
 0x1e3   : > { %v956_v58 = vpop.f32.mrf.mxu1  ;;  %1063 = vmatmul.mubr.f32.vlgmr.msra.gmra.mxu0 %v959_v52  ;;  %1167 = vmatmul.mubr.f32.vlgmr.msra.gmra.mxu1 %v959_v52  ;;  %v1179_v52 = vld [vmem:[%s4830_s5] sm:$0xff] }
 0x1e4   : > { %v962_v59 = vmax.f32 %v870_v48, %v956_v58  ;;  %1329 = vmatpush1.msra.mxu1 %v1209_v54  ;;  %1252 = vmatpush1.msra.mxu0 %v2711_v55  ;;  %v1181_v48 = vld [vmem:[%s4830_s5 + $0x10] sm:$0xff]  ;;  %v2685_v54 = vld [vmem:[%s4830_s5 + $0x120] sm:$0xff]  ;;  %v2684_v55 = vld [vmem:[%s4830_s5 + $0x118] sm:$0xff] }
 0x1e5   : > { %1330 = vmatprep.subr.mxu1 %v1208_v56  ;;  %1253 = vmatprep.subr.mxu0 %v2710_v57  ;;  %v2683_v56 = vld [vmem:[%s4830_s5 + $0x110] sm:$0xff]  ;;  %v2682_v57 = vld [vmem:[%s4830_s5 + $0x108] sm:$0xff]  ;;  %v2681_v58 = vld [vmem:[%s4830_s5 + $0x100] sm:$0xff] }
 0x1e6   : > { %2650 = vmatprep.mubr.msk.f32.mxu0 %vm991_vm5, %v962_v59  ;;  %2680 = vmatprep.mubr.msk.f32.mxu1 %vm991_vm5, %v962_v59  ;;  %v2744_v59 = vld [vmem:[%s4830_s5 + $0x2f8] sm:$0xff] }
 0x1e7   : > { %1068 = vmatmul.mubr.f32.gmra.mxu0 %v961_v60  ;;  %1172 = vmatmul.mubr.f32.gmra.mxu1 %v961_v60 }
 0x1e8   : > { %1331 = vmatpush1.msra.mxu1 %v1207_v61  ;;  %1254 = vmatpush1.msra.mxu0 %v2709_v62 }
 0x1e9   : > { %1332 = vmatprep.subr.mxu1 %v1206_v63  ;;  %1255 = vmatprep.subr.mxu0 %v2708_v0 }
 0x1ea   : > { %1333 = vmatpush1.msra.mxu1 %v1205_v1  ;;  %1256 = vmatpush1.msra.mxu0 %v2707_v2 }
 0x1eb   : > { %1334 = vmatprep.subr.mxu1 %v1204_v3  ;;  %1257 = vmatprep.subr.mxu0 %v2706_v4 }
 0x1ec   : > { %1335 = vmatpush1.msra.mxu1 %v1203_v5  ;;  %1258 = vmatpush1.msra.mxu0 %v2705_v7 }
 0x1ed   : > { %1336 = vmatprep.subr.mxu1 %v1202_v8  ;;  %1259 = vmatprep.subr.mxu0 %v2704_v9  ;;  %v2743_v9 = vld [vmem:[%s4830_s5 + $0x2f0] sm:$0xff] }
 0x1ee   : > { %1337 = vmatpush1.msra.mxu1 %v1201_v10  ;;  %1260 = vmatpush1.msra.mxu0 %v2703_v11  ;;  %v2742_v11 = vld [vmem:[%s4830_s5 + $0x2e8] sm:$0xff] }
 0x1ef   : > { %1338 = vmatprep.subr.mxu1 %v1200_v12  ;;  %1261 = vmatprep.subr.mxu0 %v2702_v13  ;;  %v2741_v12 = vld [vmem:[%s4830_s5 + $0x2e0] sm:$0xff]  ;;  %v2740_v13 = vld [vmem:[%s4830_s5 + $0x2d8] sm:$0xff] }
 0x1f0   : > { %1339 = vmatpush1.msra.mxu1 %v1199_v14  ;;  %1262 = vmatpush1.msra.mxu0 %v2701_v15  ;;  %v2739_v14 = vld [vmem:[%s4830_s5 + $0x2d0] sm:$0xff]  ;;  %v2738_v15 = vld [vmem:[%s4830_s5 + $0x2c8] sm:$0xff] }
 0x1f1   : > { %1340 = vmatprep.subr.mxu1 %v1198_v16  ;;  %1263 = vmatprep.subr.mxu0 %v2700_v17  ;;  %v2737_v16 = vld [vmem:[%s4830_s5 + $0x2c0] sm:$0xff]  ;;  %v2736_v17 = vld [vmem:[%s4830_s5 + $0x2b8] sm:$0xff] }
 0x1f2   : > { %1341 = vmatpush1.msra.mxu1 %v1197_v18  ;;  %1264 = vmatpush1.msra.mxu0 %v2699_v19  ;;  %v2735_v18 = vld [vmem:[%s4830_s5 + $0x2b0] sm:$0xff]  ;;  %v2734_v19 = vld [vmem:[%s4830_s5 + $0x2a8] sm:$0xff] }
 0x1f3   : > { %1342 = vmatprep.subr.mxu1 %v1196_v21  ;;  %1265 = vmatprep.subr.mxu0 %v2698_v22  ;;  %v2733_v21 = vld [vmem:[%s4830_s5 + $0x2a0] sm:$0xff]  ;;  %v2732_v22 = vld [vmem:[%s4830_s5 + $0x298] sm:$0xff] }
 0x1f4   : > { %1343 = vmatpush1.msra.mxu1 %v1195_v23  ;;  %1266 = vmatpush1.msra.mxu0 %v2697_v25  ;;  %v2731_v23 = vld [vmem:[%s4830_s5 + $0x290] sm:$0xff]  ;;  %v2730_v25 = vld [vmem:[%s4830_s5 + $0x288] sm:$0xff] }
 0x1f5   : > { %1344 = vmatprep.subr.mxu1 %v1194_v26  ;;  %1267 = vmatprep.subr.mxu0 %v2696_v27  ;;  %v2729_v26 = vld [vmem:[%s4830_s5 + $0x280] sm:$0xff]  ;;  %v2728_v27 = vld [vmem:[%s4830_s5 + $0x278] sm:$0xff] }
 0x1f6   : > { %1345 = vmatpush1.msra.mxu1 %v1193_v28  ;;  %1268 = vmatpush1.msra.mxu0 %v2695_v30  ;;  %v2727_v28 = vld [vmem:[%s4830_s5 + $0x270] sm:$0xff]  ;;  %v2726_v30 = vld [vmem:[%s4830_s5 + $0x268] sm:$0xff] }
 0x1f7   : > { %1346 = vmatprep.subr.mxu1 %v1192_v31  ;;  %1269 = vmatprep.subr.mxu0 %v2694_v32  ;;  %v2725_v31 = vld [vmem:[%s4830_s5 + $0x260] sm:$0xff]  ;;  %v2724_v32 = vld [vmem:[%s4830_s5 + $0x258] sm:$0xff] }
 0x1f8   : > { %1347 = vmatpush1.msra.mxu1 %v1191_v33  ;;  %1270 = vmatpush1.msra.mxu0 %v2693_v34  ;;  %v2723_v33 = vld [vmem:[%s4830_s5 + $0x250] sm:$0xff]  ;;  %v2722_v34 = vld [vmem:[%s4830_s5 + $0x248] sm:$0xff] }
 0x1f9   : > { %1348 = vmatprep.subr.mxu1 %v1190_v35  ;;  %1271 = vmatprep.subr.mxu0 %v2692_v36  ;;  %v2721_v35 = vld [vmem:[%s4830_s5 + $0x240] sm:$0xff]  ;;  %v2720_v36 = vld [vmem:[%s4830_s5 + $0x238] sm:$0xff] }
 0x1fa   : > { %1349 = vmatpush1.msra.mxu1 %v1189_v37  ;;  %1272 = vmatpush1.msra.mxu0 %v2691_v38  ;;  %v2719_v37 = vld [vmem:[%s4830_s5 + $0x230] sm:$0xff]  ;;  %v2718_v38 = vld [vmem:[%s4830_s5 + $0x228] sm:$0xff] }
 0x1fb   : > { %1350 = vmatprep.subr.mxu1 %v1188_v39  ;;  %1273 = vmatprep.subr.mxu0 %v2690_v40  ;;  %v2717_v39 = vld [vmem:[%s4830_s5 + $0x220] sm:$0xff]  ;;  %v2716_v40 = vld [vmem:[%s4830_s5 + $0x218] sm:$0xff] }
 0x1fc   : > { %1351 = vmatpush1.msra.mxu1 %v1187_v41  ;;  %1392 = vmatprep.mubr.f32.mxu1 %v3310_v6  ;;  %v2715_v41 = vld [vmem:[%s4830_s5 + $0x210] sm:$0xff] }
 0x1fd   : > { %1352 = vmatprep.subr.mxu1 %v1186_v42  ;;  %1315 = vmatprep.mubr.f32.mxu0 %v3310_v6 }
 0x1fe   : > { %1353 = vmatpush1.msra.mxu1 %v1185_v43  ;;  %1274 = vmatpush1.msra.mxu0 %v2689_v47  ;;  %v2714_v43 = vld [vmem:[%s4830_s5 + $0x208] sm:$0xff]  ;;  %v2768_v47 = vld [vmem:[%s4833_s8 + $0x158] sm:$0xff] }
 0x1ff   : > { %1354 = vmatprep.subr.mxu1 %v1184_v44  ;;  %1275 = vmatprep.subr.mxu0 %v2688_v49  ;;  %v2713_v44 = vld [vmem:[%s4830_s5 + $0x200] sm:$0xff]  ;;  %v2766_v49 = vld [vmem:[%s4833_s8 + $0x148] sm:$0xff] }
 0x200   : > { %1355 = vmatpush1.msra.mxu1 %v1183_v45  ;;  %1276 = vmatpush1.msra.mxu0 %v2687_v51  ;;  %v2764_v51 = vld [vmem:[%s4833_s8 + $0x138] sm:$0xff] }
 0x201   : > { %1356 = vmatprep.subr.mxu1 %v1182_v46  ;;  %1277 = vmatprep.subr.mxu0 %v2686_v53  ;;  %v2762_v53 = vld [vmem:[%s4833_s8 + $0x128] sm:$0xff] }
 0x202   : > { %1357 = vmatpush1.msra.mxu1 %v1181_v48  ;;  %1278 = vmatpush1.msra.mxu0 %v2685_v54  ;;  %v2767_v48 = vld [vmem:[%s4833_s8 + $0x150] sm:$0xff]  ;;  %v2761_v54 = vld [vmem:[%s4833_s8 + $0x120] sm:$0xff] }
 0x203   : > { %1358 = vmatprep.subr.mxu1 %v1180_v50  ;;  %1279 = vmatprep.subr.mxu0 %v2684_v55  ;;  %v2765_v50 = vld [vmem:[%s4833_s8 + $0x140] sm:$0xff]  ;;  %v2760_v55 = vld [vmem:[%s4833_s8 + $0x118] sm:$0xff] }
 0x204   : > { %1359 = vmatpush1.msra.mxu1 %v1179_v52  ;;  %1280 = vmatpush1.msra.mxu0 %v2683_v56  ;;  %v2763_v52 = vld [vmem:[%s4833_s8 + $0x130] sm:$0xff] }
 0x205   : > { %1281 = vmatprep.subr.mxu0 %v2682_v57  ;;  %v2759_v56 = vld [vmem:[%s4833_s8 + $0x110] sm:$0xff]  ;;  %v2758_v57 = vld [vmem:[%s4833_s8 + $0x108] sm:$0xff] }
 0x206   : > { %1282 = vmatpush1.msra.mxu0 %v2681_v58  ;;  %v2757_v58 = vld [vmem:[%s4833_s8 + $0x100] sm:$0xff] }
 0x207   : > { %1443 = vmatprep.subr.mxu0 %v2744_v59  ;;  %v2756_v59 = vld [vmem:[%s4833_s8 + $0xf8] sm:$0xff] }
 0x2a3   : > { %v1064_v60 = vpop.f32.mrf.mxu0  ;;  %v1168_v61 = vpop.f32.mrf.mxu1 }
 0x2a4   : > { %v4006_v62 = vmax.f32 %v1064_v60, %v1168_v61  ;;  %v2755_v60 = vld [vmem:[%s4833_s8 + $0xf0] sm:$0xff]  ;;  %v2754_v61 = vld [vmem:[%s4833_s8 + $0xe8] sm:$0xff] }
 0x2a5   : > { %v1066_v63 = vpop.f32.mrf.mxu0  ;;  %v1170_v0 = vpop.f32.mrf.mxu1 }
 0x2a6   : > { %1393 = vmatmul.mubr.f32.vlgmr.msra.gmra.mxu1 %v4006_v62  ;;  %v1246_v7 = vrot.slane %v4006_v62, 1  ;;  %v1438_v45 = vrot.slane %v4006_v62, 2  ;;  %v2753_v62 = vld [vmem:[%s4833_s8 + $0xe0] sm:$0xff]  ;;  %v2780_v63 = vld [vmem:[%s4833_s8 + $0x1b8] sm:$0xff]  ;;  %v2779_v0 = vld [vmem:[%s4833_s8 + $0x1b0] sm:$0xff] }
 0x2a7   : > { %v1069_v1 = vpop.f32.mrf.mxu0  ;;  %v1173_v2 = vpop.f32.mrf.mxu1  ;;  %1398 = vmatprep.mubr.f32.mxu1 %v3310_v6 }
 0x2a8   : > { %v4010_v3 = vmax.f32 %v1069_v1, %v1173_v2  ;;  %v2778_v1 = vld [vmem:[%s4833_s8 + $0x1a8] sm:$0xff]  ;;  %v2777_v2 = vld [vmem:[%s4833_s8 + $0x1a0] sm:$0xff] }
 0x2a9   : > { %v1071_v4 = vpop.f32.mrf.mxu0  ;;  %v1175_v5 = vpop.f32.mrf.mxu1 }
 0x2aa   : > { %v1247_v8 = vrot.slane %v4010_v3, 1  ;;  %1399 = vmatmul.mubr.f32.gmra.mxu1 %v4010_v3  ;;  %v1439_v42 = vrot.slane %v4010_v3, 2  ;;  %v2776_v3 = vld [vmem:[%s4833_s8 + $0x198] sm:$0xff]  ;;  %v2775_v4 = vld [vmem:[%s4833_s8 + $0x190] sm:$0xff]  ;;  %v2774_v5 = vld [vmem:[%s4833_s8 + $0x188] sm:$0xff] }
 0x2ab   : > { %1619 = vmatprep.mubr.f32.mxu1 %v3310_v6 }
 0x2ac   : > { %v1248_v10 = vsel %vm409_vm1, %v1246_v7, %v1247_v8  ;;  %v1440_v46 = vsel %vm426_vm0, %v1438_v45, %v1439_v42  ;;  %v1714_v45 = vld [vmem:[%s4833_s8 + $0x50] sm:$0xff] }
 0x2ad   : > { %1316 = vmatmul.mubr.f32.vlgmr.msra.gmra.mxu0 %v1248_v10 }
 0x2ae   : > { %1444 = vmatpush1.msra.mxu0 %v2743_v9  ;;  %1321 = vmatprep.mubr.f32.mxu0 %v3310_v6 }
 0x2af   : > { %1445 = vmatprep.subr.mxu0 %v2742_v11 }
 0x2b0   : > { %1446 = vmatpush1.msra.mxu0 %v2741_v12 }
 0x2b1   : > { %1447 = vmatprep.subr.mxu0 %v2740_v13  ;;  %1322 = vmatmul.mubr.f32.gmra.mxu0 %v1247_v8 }
 0x2b2   : > { %1448 = vmatpush1.msra.mxu0 %v2739_v14  ;;  %1507 = vmatprep.mubr.f32.mxu0 %v3310_v6 }
 0x2b3   : > { %1449 = vmatprep.subr.mxu0 %v2738_v15 }
 0x2b4   : > { %1450 = vmatpush1.msra.mxu0 %v2737_v16 }
 0x2b5   : > { %1451 = vmatprep.subr.mxu0 %v2736_v17 }
 0x2b6   : > { %1452 = vmatpush1.msra.mxu0 %v2735_v18  ;;  %v1524_v18 = vld [vmem:[%s4831_s6] sm:$0x3] }
 0x2b7   : > { %1453 = vmatprep.subr.mxu0 %v2734_v19 }
 0x2b8   : > { %1454 = vmatpush1.msra.mxu0 %v2733_v21 }
 0x2b9   : > { %1455 = vmatprep.subr.mxu0 %v2732_v22 }
 0x2ba   : > { %1456 = vmatpush1.msra.mxu0 %v2731_v23 }
 0x2bb   : > { %1457 = vmatprep.subr.mxu0 %v2730_v25 }
 0x2bc   : > { %1458 = vmatpush1.msra.mxu0 %v2729_v26  ;;  %v1533_v26 = vrot.slane %v1524_v18, %v760_v29  ;;  %v1544_v29 = vld [vmem:[%s4832_s7] sm:$0x7f] }
 0x2bd   : > { %1459 = vmatprep.subr.mxu0 %v2728_v27 }
 0x2be   : > { %1460 = vmatpush1.msra.mxu0 %v2727_v28 }
 0x2bf   : > { %1461 = vmatprep.subr.mxu0 %v2726_v30  ;;  %v1529_v30 = vrot.slane %v1524_v18, %v756_v24  ;;  %v1719_v24 = vld [vmem:[%s4833_s8 + $0x78] sm:$0xff]  ;;  %v1918_v18 = vld [vmem:[%s4834_s9 + $0x60] sm:$0xff] }
 0x2c0   : > { %1462 = vmatpush1.msra.mxu0 %v2725_v31 }
 0x2c1   : > { %1463 = vmatprep.subr.mxu0 %v2724_v32 }
 0x2c2   : > { %1464 = vmatpush1.msra.mxu0 %v2723_v33 }
 0x2c3   : > { %1465 = vmatprep.subr.mxu0 %v2722_v34 }
 0x2c4   : > { %1466 = vmatpush1.msra.mxu0 %v2721_v35 }
 0x2c5   : > { %1467 = vmatprep.subr.mxu0 %v2720_v36 }
 0x2c6   : > { %1468 = vmatpush1.msra.mxu0 %v2719_v37 }
 0x2c7   : > { %1469 = vmatprep.subr.mxu0 %v2718_v38 }
 0x2c8   : > { %1470 = vmatpush1.msra.mxu0 %v2717_v39 }
 0x2c9   : > { %1471 = vmatprep.subr.mxu0 %v2716_v40 }
 0x2ca   : > { %1472 = vmatpush1.msra.mxu0 %v2715_v41  ;;  %v1718_v41 = vld [vmem:[%s4833_s8 + $0x70] sm:$0xff] }
 0x2cb   : > { %1473 = vmatprep.subr.mxu0 %v2714_v43  ;;  %v1716_v43 = vld [vmem:[%s4833_s8 + $0x60] sm:$0xff] }
 0x2cc   : > { %1474 = vmatpush1.msra.mxu0 %v2713_v44  ;;  %v1715_v44 = vld [vmem:[%s4833_s8 + $0x58] sm:$0xff] }
 0x2cd   : > { %1508 = vmatmul.mubr.f32.vlgmr.msra.gmra.mxu0 %v1440_v46  ;;  %1834 = vmatprep.subr.mxu0 %v3310_v6  ;;  %v1713_v46 = vld [vmem:[%s4833_s8 + $0x48] sm:$0xff] }
 0x2ce   : > { %1513 = vmatprep.mubr.f32.mxu0 %v3310_v6  ;;  %1835 = vmatpush1.msra.mxu0 %v2768_v47  ;;  %v1712_v47 = vld [vmem:[%s4833_s8 + $0x40] sm:$0xff] }
 0x2cf   : > { %1836 = vmatprep.subr.mxu0 %v3310_v6 }
 0x2d0   : > { %1837 = vmatpush1.msra.mxu0 %v2767_v48  ;;  %v1711_v48 = vld [vmem:[%s4833_s8 + $0x38] sm:$0xff] }
 0x2d1   : > { %1514 = vmatmul.mubr.f32.gmra.mxu0 %v1439_v42  ;;  %1838 = vmatprep.subr.mxu0 %v3310_v6  ;;  %v1717_v42 = vld [vmem:[%s4833_s8 + $0x68] sm:$0xff] }
 0x2d2   : > { %1839 = vmatpush1.msra.mxu0 %v2766_v49  ;;  %v1710_v49 = vld [vmem:[%s4833_s8 + $0x30] sm:$0xff] }
 0x2d3   : > { %1840 = vmatprep.subr.mxu0 %v3310_v6 }
 0x2d4   : > { %1841 = vmatpush1.msra.mxu0 %v2765_v50  ;;  %v1709_v50 = vld [vmem:[%s4833_s8 + $0x28] sm:$0xff] }
 0x2d5   : > { %1842 = vmatprep.subr.mxu0 %v3310_v6 }
 0x2d6   : > { %1843 = vmatpush1.msra.mxu0 %v2764_v51  ;;  %v1708_v51 = vld [vmem:[%s4833_s8 + $0x20] sm:$0xff] }
 0x2d7   : > { %1844 = vmatprep.subr.mxu0 %v3310_v6 }
 0x2d8   : > { %1845 = vmatpush1.msra.mxu0 %v2763_v52  ;;  %v1707_v52 = vld [vmem:[%s4833_s8 + $0x18] sm:$0xff] }
 0x2d9   : > { %1846 = vmatprep.subr.mxu0 %v3310_v6 }
 0x2da   : > { %1847 = vmatpush1.msra.mxu0 %v2762_v53  ;;  %v1706_v53 = vld [vmem:[%s4833_s8 + $0x10] sm:$0xff] }
 0x2db   : > { %1848 = vmatprep.subr.mxu0 %v3310_v6 }
 0x2dc   : > { %1849 = vmatpush1.msra.mxu0 %v2761_v54  ;;  %v1705_v54 = vld [vmem:[%s4833_s8 + $0x8] sm:$0xff] }
 0x2dd   : > { %1850 = vmatprep.subr.mxu0 %v3310_v6 }
 0x2de   : > { %1851 = vmatpush1.msra.mxu0 %v2760_v55  ;;  %v1704_v55 = vld [vmem:[%s4833_s8] sm:$0xff] }
 0x2df   : > { %1852 = vmatprep.subr.mxu0 %v3310_v6 }
 0x2e0   : > { %1853 = vmatpush1.msra.mxu0 %v2759_v56  ;;  %v1731_v56 = vld [vmem:[%s4833_s8 + $0xd8] sm:$0xff] }
 0x2e1   : > { %1854 = vmatprep.subr.mxu0 %v3310_v6 }
 0x2e2   : > { %1855 = vmatpush1.msra.mxu0 %v2758_v57  ;;  %v1730_v57 = vld [vmem:[%s4833_s8 + $0xd0] sm:$0xff] }
 0x2e3   : > { %1856 = vmatprep.subr.mxu0 %v3310_v6 }
 0x2e4   : > { %1857 = vmatpush1.msra.mxu0 %v2757_v58  ;;  %v1729_v58 = vld [vmem:[%s4833_s8 + $0xc8] sm:$0xff] }
 0x2e5   : > { %1858 = vmatprep.subr.mxu0 %v3310_v6 }
 0x2e6   : > { %1859 = vmatpush1.msra.mxu0 %v2756_v59  ;;  %v1728_v59 = vld [vmem:[%s4833_s8 + $0xc0] sm:$0xff] }
 0x2e7   : > { %1860 = vmatprep.subr.mxu0 %v3310_v6 }
 0x2e8   : > { %1861 = vmatpush1.msra.mxu0 %v2755_v60  ;;  %v1727_v60 = vld [vmem:[%s4833_s8 + $0xb8] sm:$0xff] }
 0x2e9   : > { %1862 = vmatprep.subr.mxu0 %v3310_v6 }
 0x2ea   : > { %1863 = vmatpush1.msra.mxu0 %v2754_v61  ;;  %v1726_v61 = vld [vmem:[%s4833_s8 + $0xb0] sm:$0xff] }
 0x2eb   : > { %1864 = vmatprep.subr.mxu0 %v3310_v6 }
 0x2ec   : > { %1865 = vmatpush1.msra.mxu0 %v2753_v62  ;;  %v1725_v62 = vld [vmem:[%s4833_s8 + $0xa8] sm:$0xff] }
 0x2ed   : > { %1874 = vmatprep.subr.mxu0 %v3310_v6 }
 0x2ee   : > { %1875 = vmatpush2.msra.mxu0 %v2780_v63  ;;  %v1724_v63 = vld [vmem:[%s4833_s8 + $0xa0] sm:$0xff] }
 0x2ef   : > { %1876 = vmatprep.subr.mxu0 %v3310_v6 }
 0x2f0   : > { %1877 = vmatpush2.msra.mxu0 %v2779_v0  ;;  %v2773_v0 = vld [vmem:[%s4833_s8 + $0x180] sm:$0xff] }
 0x2f1   : > { %1878 = vmatprep.subr.mxu0 %v3310_v6 }
 0x2f2   : > { %1879 = vmatpush2.msra.mxu0 %v2778_v1  ;;  %v1723_v1 = vld [vmem:[%s4833_s8 + $0x98] sm:$0xff] }
 0x2f3   : > { %1880 = vmatprep.subr.mxu0 %v3310_v6 }
 0x2f4   : > { %1881 = vmatpush2.msra.mxu0 %v2777_v2  ;;  %v2772_v2 = vld [vmem:[%s4833_s8 + $0x178] sm:$0xff] }
 0x2f5   : > { %1882 = vmatprep.subr.mxu0 %v3310_v6 }
 0x2f6   : > { %1883 = vmatpush2.msra.mxu0 %v2776_v3  ;;  %v1722_v3 = vld [vmem:[%s4833_s8 + $0x90] sm:$0xff] }
 0x2f7   : > { %1884 = vmatprep.subr.mxu0 %v3310_v6 }
 0x2f8   : > { %1885 = vmatpush2.msra.mxu0 %v2775_v4  ;;  %v2771_v4 = vld [vmem:[%s4833_s8 + $0x170] sm:$0xff] }
 0x2f9   : > { %1886 = vmatprep.subr.mxu0 %v3310_v6 }
 0x2fa   : > { %1887 = vmatpush2.msra.mxu0 %v2774_v5  ;;  %v1721_v5 = vld [vmem:[%s4833_s8 + $0x88] sm:$0xff] }
 0x2fb   : > { %1888 = vmatprep.subr.mxu0 %v3310_v6 }
 0x2fc   : > { %1889 = vmatpush2.msra.mxu0 %v2773_v0  ;;  %v2820_v0 = vld [vmem:[%s4834_s9 + $0x188] sm:$0xff] }
 0x2fd   : > { %1890 = vmatprep.subr.mxu0 %v3310_v6 }
 0x2fe   : > { %1891 = vmatpush2.msra.mxu0 %v2772_v2  ;;  %v2819_v2 = vld [vmem:[%s4834_s9 + $0x180] sm:$0xff] }
 0x2ff   : > { %1892 = vmatprep.subr.mxu0 %v3310_v6 }
 0x300   : > { %1893 = vmatpush2.msra.mxu0 %v2771_v4  ;;  %v2818_v4 = vld [vmem:[%s4834_s9 + $0x178] sm:$0xff] }
 0x301   : > { %1894 = vmatprep.subr.mxu0 %v3310_v6 }
 0x366   : > { %v1394_v9 = vpop.f32.mrf.mxu1 }
 0x368   : > { %v1396_v11 = vpop.f32.mrf.mxu1 }
 0x36a   : > { %v1400_v13 = vpop.f32.mrf.mxu1 }
 0x36c   : > { %v1402_v19 = vpop.f32.mrf.mxu1 }
 0x36d   : > { %v1317_v7 = vpop.f32.mrf.mxu0 }
 0x36e   : > { %v1395_v21 = vadd.f32 %v1394_v9, %v1317_v7  ;;  %v2770_v7 = vld [vmem:[%s4833_s8 + $0x168] sm:$0xff]  ;;  %v2769_v9 = vld [vmem:[%s4833_s8 + $0x160] sm:$0xff] }
 0x36f   : > { %v1319_v8 = vpop.f32.mrf.mxu0  ;;  %1895 = vmatpush2.msra.mxu0 %v2770_v7  ;;  %v2817_v7 = vld [vmem:[%s4834_s9 + $0x170] sm:$0xff] }
 0x370   : > { %v1397_v16 = vadd.f32 %v1396_v11, %v1319_v8  ;;  %v1720_v8 = vld [vmem:[%s4833_s8 + $0x80] sm:$0xff]  ;;  %1896 = vmatprep.subr.mxu0 %v3310_v6 }
 0x371   : > { %v1323_v10 = vpop.f32.mrf.mxu0  ;;  %1897 = vmatpush2.msra.mxu0 %v2769_v9  ;;  %v2816_v9 = vld [vmem:[%s4834_s9 + $0x168] sm:$0xff] }
 0x372   : > { %v1401_v17 = vadd.f32 %v1400_v13, %v1323_v10  ;;  %3013 = vmatprep.subr.mxu0 %v3310_v6 }
 0x373   : > { %v1325_v12 = vpop.f32.mrf.mxu0 }
 0x374   : > { %v1403_v23 = vadd.f32 %v1402_v19, %v1325_v12  ;;  %v2795_v19 = vld [vmem:[%s4834_s9 + $0xd0] sm:$0xff] }
 0x38d   : > { %v1509_v14 = vpop.f32.mrf.mxu0 }
 0x38e   : > { %v1520_v28 = vadd.f32 %v1509_v14, %v1395_v21  ;;  %v1917_v21 = vld [vmem:[%s4834_s9 + $0x58] sm:$0xff] }
 0x38f   : > { %v1511_v15 = vpop.f32.mrf.mxu0 }
 0x390   : > { %v1521_v25 = vadd.f32 %v1511_v15, %v1397_v16  ;;  %v1536_v36 = vadd.f32 %v1529_v30, %v1520_v28  ;;  %v1919_v16 = vld [vmem:[%s4834_s9 + $0x68] sm:$0xff]  ;;  %v1914_v28 = vld [vmem:[%s4834_s9 + $0x40] sm:$0xff] }
 0x391   : > { %v1515_v22 = vpop.f32.mrf.mxu0 }
 0x392   : > { %v1522_v27 = vadd.f32 %v1515_v22, %v1401_v17  ;;  %v1537_v34 = vadd.f32 %v1533_v26, %v1521_v25  ;;  %v1540_v40 = vmax.f32 %v1536_v36, 0.0  ;;  %v2796_v17 = vld [vmem:[%s4834_s9 + $0xd8] sm:$0xff]  ;;  %v2794_v22 = vld [vmem:[%s4834_s9 + $0xc8] sm:$0xff]  ;;  %v2793_v25 = vld [vmem:[%s4834_s9 + $0xc0] sm:$0xff] }
 0x393   : > { %v1517_v31 = vpop.f32.mrf.mxu0  ;;  %v2788_v36 = vld [vmem:[%s4834_s9 + $0x98] sm:$0xff] }
 0x394   : > { %v1523_v32 = vadd.f32 %v1517_v31, %v1403_v23  ;;  %v1538_v33 = vadd.f32 %v1529_v30, %v1522_v27  ;;  %v1541_v39 = vmax.f32 %v1537_v34, 0.0  ;;  %v1916_v23 = vld [vmem:[%s4834_s9 + $0x50] sm:$0xff]  ;;  %v2792_v27 = vld [vmem:[%s4834_s9 + $0xb8] sm:$0xff]  ;;  %v2789_v34 = vld [vmem:[%s4834_s9 + $0xa0] sm:$0xff] }
 0x395   : > { %v2791_v30 = vld [vmem:[%s4834_s9 + $0xb0] sm:$0xff]  ;;  %v1913_v31 = vld [vmem:[%s4834_s9 + $0x38] sm:$0xff] }
 0x396   : > { %v1539_v35 = vadd.f32 %v1533_v26, %v1523_v32  ;;  %v1542_v38 = vmax.f32 %v1538_v33, 0.0  ;;  %v1915_v26 = vld [vmem:[%s4834_s9 + $0x48] sm:$0xff]  ;;  %v1912_v33 = vld [vmem:[%s4834_s9 + $0x30] sm:$0xff] }
 0x397   : > { %v2790_v32 = vld [vmem:[%s4834_s9 + $0xa8] sm:$0xff] }
 0x398   : > { %v1543_v37 = vmax.f32 %v1539_v35, 0.0  ;;  %v1911_v35 = vld [vmem:[%s4834_s9 + $0x28] sm:$0xff] }
 0x39a   : > { %2745 = vmatprep.subr.msk.mxu1 %vm426_vm0, %v1543_v37 }
 0x39b   : > { %2746 = vmatpush1.msk.msra.mxu1 %vm426_vm0, %v1542_v38 }
 0x39c   : > { %1585 = vmatprep.subr.mxu1 %v1541_v39 }
 0x39d   : > { %1586 = vmatpush1.msra.mxu1 %v1540_v40 }
 0x39e   : > { %2747 = vmatmul.mubr.msk.f32.vlgmr.msra.gmra.mxu1 %vm1545_vm6, %v1544_v29  ;;  %2749 = vmatprep.subr.msk.mxu1 %vm426_vm0, %v1543_v37  ;;  %v1910_v37 = vld [vmem:[%s4834_s9 + $0x20] sm:$0xff]  ;;  %v1908_v29 = vld [vmem:[%s4834_s9 + $0x10] sm:$0xff] }
 0x39f   : > { %2750 = vmatpush1.msk.msra.mxu1 %vm426_vm0, %v1542_v38  ;;  %1695 = vmatprep.mubr.f32.mxu1 %v3310_v6  ;;  %v2787_v38 = vld [vmem:[%s4834_s9 + $0x90] sm:$0xff] }
 0x3a0   : > { %1661 = vmatprep.subr.mxu1 %v1541_v39  ;;  %v1909_v39 = vld [vmem:[%s4834_s9 + $0x18] sm:$0xff] }
 0x3a1   : > { %1662 = vmatpush1.msra.mxu1 %v1540_v40  ;;  %v2786_v40 = vld [vmem:[%s4834_s9 + $0x88] sm:$0xff] }
 0x3a2   : > { %2751 = vmatmul.mubr.msk.f32.vlgmr.msra.gmra.mxu1 %vm1545_vm6, %v2748_v20  ;;  %1735 = vmatprep.subr.mxu1 %v3310_v6  ;;  %v2785_v20 = vld [vmem:[%s4834_s9 + $0x80] sm:$0xff] }
 0x3a3   : > { %1736 = vmatpush1.msra.mxu1 %v1719_v24  ;;  %v1907_v24 = vld [vmem:[%s4834_s9 + $0x8] sm:$0xff] }
 0x3a4   : > { %1737 = vmatprep.subr.mxu1 %v3310_v6 }
 0x3a5   : > { %1738 = vmatpush1.msra.mxu1 %v1718_v41  ;;  %v1906_v41 = vld [vmem:[%s4834_s9] sm:$0xff] }
 0x3a6   : > { %1739 = vmatprep.subr.mxu1 %v3310_v6 }
 0x3a7   : > { %1740 = vmatpush1.msra.mxu1 %v1717_v42  ;;  %v2784_v42 = vld [vmem:[%s4834_s9 + $0x78] sm:$0xff] }
 0x3a8   : > { %1741 = vmatprep.subr.mxu1 %v3310_v6 }
 0x3a9   : > { %1742 = vmatpush1.msra.mxu1 %v1716_v43  ;;  %v2783_v43 = vld [vmem:[%s4834_s9 + $0x70] sm:$0xff] }
 0x3aa   : > { %1743 = vmatprep.subr.mxu1 %v3310_v6 }
 0x3ab   : > { %1744 = vmatpush1.msra.mxu1 %v1715_v44 }
 0x3ac   : > { %1745 = vmatprep.subr.mxu1 %v3310_v6 }
 0x3ad   : > { %1746 = vmatpush1.msra.mxu1 %v1714_v45 }
 0x3ae   : > { %1747 = vmatprep.subr.mxu1 %v3310_v6 }
 0x3af   : > { %1748 = vmatpush1.msra.mxu1 %v1713_v46 }
 0x3b0   : > { %1749 = vmatprep.subr.mxu1 %v3310_v6 }
 0x3b1   : > { %1750 = vmatpush1.msra.mxu1 %v1712_v47  ;;  %v2811_v47 = vld [vmem:[%s4834_s9 + $0x148] sm:$0xff] }
 0x3b2   : > { %1751 = vmatprep.subr.mxu1 %v3310_v6 }
 0x3b3   : > { %1752 = vmatpush1.msra.mxu1 %v1711_v48 }
 0x3b4   : > { %1753 = vmatprep.subr.mxu1 %v3310_v6 }
 0x3b5   : > { %1754 = vmatpush1.msra.mxu1 %v1710_v49 }
 0x3b6   : > { %1755 = vmatprep.subr.mxu1 %v3310_v6 }
 0x3b7   : > { %1756 = vmatpush1.msra.mxu1 %v1709_v50 }
 0x3b8   : > { %1757 = vmatprep.subr.mxu1 %v3310_v6 }
 0x3b9   : > { %1758 = vmatpush1.msra.mxu1 %v1708_v51  ;;  %v2810_v51 = vld [vmem:[%s4834_s9 + $0x140] sm:$0xff] }
 0x3ba   : > { %1759 = vmatprep.subr.mxu1 %v3310_v6 }
 0x3bb   : > { %1760 = vmatpush1.msra.mxu1 %v1707_v52  ;;  %v2826_v52 = vld [vmem:[%s4834_s9 + $0x1b8] sm:$0xff] }
 0x3bc   : > { %1761 = vmatprep.subr.mxu1 %v3310_v6 }
 0x3bd   : > { %1762 = vmatpush1.msra.mxu1 %v1706_v53  ;;  %v2809_v53 = vld [vmem:[%s4834_s9 + $0x138] sm:$0xff] }
 0x3be   : > { %1763 = vmatprep.subr.mxu1 %v3310_v6 }
 0x3bf   : > { %1764 = vmatpush1.msra.mxu1 %v1705_v54  ;;  %v2825_v54 = vld [vmem:[%s4834_s9 + $0x1b0] sm:$0xff] }
 0x3c0   : > { %1765 = vmatprep.subr.mxu1 %v3310_v6 }
 0x3c1   : > { %1766 = vmatpush1.msra.mxu1 %v1704_v55  ;;  %v2808_v55 = vld [vmem:[%s4834_s9 + $0x130] sm:$0xff] }
 0x3c2   : > { %1775 = vmatprep.subr.mxu1 %v3310_v6 }
 0x3c3   : > { %1776 = vmatpush2.msra.mxu1 %v1731_v56  ;;  %v2824_v56 = vld [vmem:[%s4834_s9 + $0x1a8] sm:$0xff] }
 0x3c4   : > { %1777 = vmatprep.subr.mxu1 %v3310_v6 }
 0x3c5   : > { %1778 = vmatpush2.msra.mxu1 %v1730_v57  ;;  %v2807_v57 = vld [vmem:[%s4834_s9 + $0x128] sm:$0xff] }
 0x3c6   : > { %1779 = vmatprep.subr.mxu1 %v3310_v6 }
 0x3c7   : > { %1780 = vmatpush2.msra.mxu1 %v1729_v58  ;;  %v2823_v58 = vld [vmem:[%s4834_s9 + $0x1a0] sm:$0xff] }
 0x3c8   : > { %1781 = vmatprep.subr.mxu1 %v3310_v6 }
 0x3c9   : > { %1782 = vmatpush2.msra.mxu1 %v1728_v59  ;;  %v2806_v59 = vld [vmem:[%s4834_s9 + $0x120] sm:$0xff] }
 0x3ca   : > { %1783 = vmatprep.subr.mxu1 %v3310_v6 }
 0x3cb   : > { %1784 = vmatpush2.msra.mxu1 %v1727_v60  ;;  %v2822_v60 = vld [vmem:[%s4834_s9 + $0x198] sm:$0xff] }
 0x3cc   : > { %1785 = vmatprep.subr.mxu1 %v3310_v6 }
 0x3cd   : > { %1786 = vmatpush2.msra.mxu1 %v1726_v61  ;;  %v2805_v61 = vld [vmem:[%s4834_s9 + $0x118] sm:$0xff] }
 0x3ce   : > { %1787 = vmatprep.subr.mxu1 %v3310_v6 }
 0x3cf   : > { %1788 = vmatpush2.msra.mxu1 %v1725_v62  ;;  %v2821_v62 = vld [vmem:[%s4834_s9 + $0x190] sm:$0xff] }
 0x3d0   : > { %1789 = vmatprep.subr.mxu1 %v3310_v6 }
 0x3d1   : > { %1790 = vmatpush2.msra.mxu1 %v1724_v63  ;;  %v2804_v63 = vld [vmem:[%s4834_s9 + $0x110] sm:$0xff] }
 0x3d2   : > { %1791 = vmatprep.subr.mxu1 %v3310_v6 }
 0x3d3   : > { %1792 = vmatpush2.msra.mxu1 %v1723_v1  ;;  %v2803_v1 = vld [vmem:[%s4834_s9 + $0x108] sm:$0xff] }
 0x3d4   : > { %1793 = vmatprep.subr.mxu1 %v3310_v6 }
 0x3d5   : > { %1794 = vmatpush2.msra.mxu1 %v1722_v3  ;;  %v2802_v3 = vld [vmem:[%s4834_s9 + $0x100] sm:$0xff] }
 0x3d6   : > { %1795 = vmatprep.subr.mxu1 %v3310_v6 }
 0x3d7   : > { %1796 = vmatpush2.msra.mxu1 %v1721_v5  ;;  %v2801_v5 = vld [vmem:[%s4834_s9 + $0xf8] sm:$0xff] }
 0x3d8   : > { %1797 = vmatprep.subr.mxu1 %v3310_v6 }
 0x3d9   : > { %1798 = vmatpush2.msra.mxu1 %v1720_v8  ;;  %v2800_v8 = vld [vmem:[%s4834_s9 + $0xf0] sm:$0xff] }
 0x3da   : > { %2982 = vmatprep.subr.mxu1 %v3310_v6 }
 0x45e   : > { %v1621_v10 = vpop.f32.mrf.mxu1 }
 0x460   : > { %v1623_v11 = vpop.f32.mrf.mxu1 }
 0x462   : > { %v1697_v12 = vpop.f32.mrf.mxu1 }
 0x463   : > { %v1702_v15 = vmax.f32 %v1621_v10, %v1697_v12  ;;  %v2799_v10 = vld [vmem:[%s4834_s9 + $0xe8] sm:$0xff]  ;;  %v2798_v12 = vld [vmem:[%s4834_s9 + $0xe0] sm:$0xff] }
 0x464   : > { %v1699_v13 = vpop.f32.mrf.mxu1 }
 0x465   : > { %v1703_v14 = vmax.f32 %v1623_v11, %v1699_v13  ;;  %v2815_v11 = vld [vmem:[%s4834_s9 + $0x160] sm:$0xff]  ;;  %v2814_v13 = vld [vmem:[%s4834_s9 + $0x158] sm:$0xff] }
 0x467   : > { %2752 = vmatprep.mubr.msk.f32.mxu1 %vm991_vm5, %v1703_v14  ;;  %2781 = vmatprep.mubr.msk.f32.mxu0 %vm991_vm5, %v1703_v14 }
 0x468   : > { %1800 = vmatmul.mubr.f32.vlgmr.msra.gmra.mxu1 %v1702_v15  ;;  %1899 = vmatmul.mubr.f32.vlgmr.msra.gmra.mxu0 %v1702_v15  ;;  %v2813_v15 = vld [vmem:[%s4834_s9 + $0x150] sm:$0xff] }
 0x469   : > { %2983 = vmatpush3.msra.mxu1 %v1919_v16  ;;  %3014 = vmatpush3.msra.mxu0 %v2796_v17  ;;  %v2841_v16 = vld [vmem:[%s4834_s9 + $0x228] sm:$0xff] }
 0x46a   : > { %2984 = vmatprep.subr.mxu1 %v3310_v6  ;;  %3015 = vmatprep.subr.mxu0 %v3310_v6 }
 0x46b   : > { %2985 = vmatpush3.msra.mxu1 %v1918_v18  ;;  %3016 = vmatpush3.msra.mxu0 %v2795_v19  ;;  %v2840_v18 = vld [vmem:[%s4834_s9 + $0x220] sm:$0xff]  ;;  %v2856_v19 = vld [vmem:[%s4834_s9 + $0x298] sm:$0xff] }
 0x46c   : > { %2986 = vmatprep.subr.mxu1 %v3310_v6  ;;  %3017 = vmatprep.subr.mxu0 %v3310_v6 }
 0x46d   : > { %2987 = vmatpush3.msra.mxu1 %v1917_v21  ;;  %3018 = vmatpush3.msra.mxu0 %v2794_v22  ;;  %v2839_v21 = vld [vmem:[%s4834_s9 + $0x218] sm:$0xff]  ;;  %v2855_v22 = vld [vmem:[%s4834_s9 + $0x290] sm:$0xff] }
 0x46e   : > { %2988 = vmatprep.subr.mxu1 %v3310_v6  ;;  %3019 = vmatprep.subr.mxu0 %v3310_v6 }
 0x46f   : > { %2989 = vmatpush3.msra.mxu1 %v1916_v23  ;;  %3020 = vmatpush3.msra.mxu0 %v2793_v25  ;;  %v2838_v23 = vld [vmem:[%s4834_s9 + $0x210] sm:$0xff]  ;;  %v2854_v25 = vld [vmem:[%s4834_s9 + $0x288] sm:$0xff] }
 0x470   : > { %2990 = vmatprep.subr.mxu1 %v3310_v6  ;;  %3021 = vmatprep.subr.mxu0 %v3310_v6 }
 0x471   : > { %2991 = vmatpush3.msra.mxu1 %v1915_v26  ;;  %3022 = vmatpush3.msra.mxu0 %v2792_v27  ;;  %v2837_v26 = vld [vmem:[%s4834_s9 + $0x208] sm:$0xff]  ;;  %v2853_v27 = vld [vmem:[%s4834_s9 + $0x280] sm:$0xff] }
 0x472   : > { %2992 = vmatprep.subr.mxu1 %v3310_v6  ;;  %3023 = vmatprep.subr.mxu0 %v3310_v6 }
 0x473   : > { %2993 = vmatpush3.msra.mxu1 %v1914_v28  ;;  %3024 = vmatpush3.msra.mxu0 %v2791_v30  ;;  %v2836_v28 = vld [vmem:[%s4834_s9 + $0x200] sm:$0xff]  ;;  %v2852_v30 = vld [vmem:[%s4834_s9 + $0x278] sm:$0xff] }
 0x474   : > { %2994 = vmatprep.subr.mxu1 %v3310_v6  ;;  %3025 = vmatprep.subr.mxu0 %v3310_v6 }
 0x475   : > { %2995 = vmatpush3.msra.mxu1 %v1913_v31  ;;  %3026 = vmatpush3.msra.mxu0 %v2790_v32  ;;  %v2835_v31 = vld [vmem:[%s4834_s9 + $0x1f8] sm:$0xff]  ;;  %v2851_v32 = vld [vmem:[%s4834_s9 + $0x270] sm:$0xff] }
 0x476   : > { %2996 = vmatprep.subr.mxu1 %v3310_v6  ;;  %3027 = vmatprep.subr.mxu0 %v3310_v6 }
 0x477   : > { %2997 = vmatpush3.msra.mxu1 %v1912_v33  ;;  %3028 = vmatpush3.msra.mxu0 %v2789_v34  ;;  %v2834_v33 = vld [vmem:[%s4834_s9 + $0x1f0] sm:$0xff]  ;;  %v2850_v34 = vld [vmem:[%s4834_s9 + $0x268] sm:$0xff] }
 0x478   : > { %2998 = vmatprep.subr.mxu1 %v3310_v6  ;;  %3029 = vmatprep.subr.mxu0 %v3310_v6 }
 0x479   : > { %2999 = vmatpush3.msra.mxu1 %v1911_v35  ;;  %3030 = vmatpush3.msra.mxu0 %v2788_v36  ;;  %v2833_v35 = vld [vmem:[%s4834_s9 + $0x1e8] sm:$0xff]  ;;  %v2849_v36 = vld [vmem:[%s4834_s9 + $0x260] sm:$0xff] }
 0x47a   : > { %3000 = vmatprep.subr.mxu1 %v3310_v6  ;;  %3031 = vmatprep.subr.mxu0 %v3310_v6 }
 0x47b   : > { %3001 = vmatpush3.msra.mxu1 %v1910_v37  ;;  %3032 = vmatpush3.msra.mxu0 %v2787_v38  ;;  %v2832_v37 = vld [vmem:[%s4834_s9 + $0x1e0] sm:$0xff]  ;;  %v2848_v38 = vld [vmem:[%s4834_s9 + $0x258] sm:$0xff] }
 0x47c   : > { %3002 = vmatprep.subr.mxu1 %v3310_v6  ;;  %3033 = vmatprep.subr.mxu0 %v3310_v6 }
 0x47d   : > { %3003 = vmatpush3.msra.mxu1 %v1909_v39  ;;  %3034 = vmatpush3.msra.mxu0 %v2786_v40  ;;  %v2831_v39 = vld [vmem:[%s4834_s9 + $0x1d8] sm:$0xff]  ;;  %v2847_v40 = vld [vmem:[%s4834_s9 + $0x250] sm:$0xff] }
 0x47e   : > { %3004 = vmatprep.subr.mxu1 %v3310_v6  ;;  %3035 = vmatprep.subr.mxu0 %v3310_v6 }
 0x47f   : > { %3005 = vmatpush3.msra.mxu1 %v1908_v29  ;;  %3036 = vmatpush3.msra.mxu0 %v2785_v20  ;;  %v2830_v29 = vld [vmem:[%s4834_s9 + $0x1d0] sm:$0xff]  ;;  %v2846_v20 = vld [vmem:[%s4834_s9 + $0x248] sm:$0xff] }
 0x480   : > { %3006 = vmatprep.subr.mxu1 %v3310_v6  ;;  %3037 = vmatprep.subr.mxu0 %v3310_v6 }
 0x481   : > { %3007 = vmatpush3.msra.mxu1 %v1907_v24  ;;  %3038 = vmatpush3.msra.mxu0 %v2784_v42  ;;  %v2829_v24 = vld [vmem:[%s4834_s9 + $0x1c8] sm:$0xff]  ;;  %v2828_v42 = vld [vmem:[%s4834_s9 + $0x1c0] sm:$0xff] }
 0x482   : > { %3008 = vmatprep.subr.mxu1 %v3310_v6  ;;  %3010 = vmatprep.mubr.msk.f32.mxu1 %vm3311_vm7, %v3310_v6 }
 0x483   : > { %3009 = vmatpush3.msra.mxu1 %v1906_v41  ;;  %3039 = vmatprep.subr.mxu0 %v3310_v6  ;;  %v2845_v41 = vld [vmem:[%s4834_s9 + $0x240] sm:$0xff] }
 0x484   : > { %3044 = vmatprep.subr.mxu1 %v3310_v6  ;;  %3040 = vmatpush3.msra.mxu0 %v2783_v43  ;;  %v2844_v43 = vld [vmem:[%s4834_s9 + $0x238] sm:$0xff] }
 0x485   : > { %3041 = vmatprep.mubr.msk.f32.mxu0 %vm3311_vm7, %v3310_v6  ;;  %3075 = vmatprep.subr.mxu0 %v3310_v6 }
 0x528   : > { %v1801_v44 = vpop.f32.mrf.mxu1  ;;  %v1900_v45 = vpop.f32.mrf.mxu0 }
 0x529   : > { %v4478_v46 = vmax.f32 %v1801_v44, %v1900_v45  ;;  %v2843_v45 = vld [vmem:[%s4834_s9 + $0x230] sm:$0xff] }
 0x52a   : > { %v1803_v48 = vpop.f32.mrf.mxu1  ;;  %v1902_v49 = vpop.f32.mrf.mxu0 }
 0x52b   : > { %3011 = vmatmul.mubr.msk.f32.vlgmr.msra.gmra.mxu1 %vm1920_vm8, %v4478_v46  ;;  %v2010_v50 = vrot.slane %v4478_v46, 1  ;;  %v2099_v14 = vrot.slane %v4478_v46, 2  ;;  %v2188_v17 = vrot.slane %v4478_v46, 3  ;;  %v2277_v44 = vrot.slane %v4478_v46, 4  ;;  %v2870_v49 = vld [vmem:[%s4834_s9 + $0x300] sm:$0xff] }
 0x52c   : > { %3045 = vmatpush3.msra.mxu1 %v2811_v47  ;;  %3072 = vmatprep.mubr.msk.f32.mxu1 %vm3311_vm7, %v3310_v6  ;;  %v2871_v47 = vld [vmem:[%s4834_s9 + $0x308] sm:$0xff]  ;;  %v2366_v48 = vrot.slane %v4478_v46, 5 }
 0x52d   : > { %3046 = vmatprep.subr.mxu1 %v3310_v6  ;;  %3042 = vmatmul.mubr.msk.f32.vlgmr.msra.gmra.mxu0 %vm1920_vm8, %v2010_v50  ;;  %v2869_v50 = vld [vmem:[%s4834_s9 + $0x2f8] sm:$0xff] }
 0x52e   : > { %3047 = vmatpush3.msra.mxu1 %v2810_v51  ;;  %3076 = vmatpush3.msra.mxu0 %v2826_v52  ;;  %v2868_v51 = vld [vmem:[%s4834_s9 + $0x2f0] sm:$0xff]  ;;  %v2867_v52 = vld [vmem:[%s4834_s9 + $0x2e8] sm:$0xff] }
 0x52f   : > { %3048 = vmatprep.subr.mxu1 %v3310_v6  ;;  %3077 = vmatprep.subr.mxu0 %v3310_v6 }
 0x530   : > { %3049 = vmatpush3.msra.mxu1 %v2809_v53  ;;  %3078 = vmatpush3.msra.mxu0 %v2825_v54  ;;  %v2866_v53 = vld [vmem:[%s4834_s9 + $0x2e0] sm:$0xff]  ;;  %v2865_v54 = vld [vmem:[%s4834_s9 + $0x2d8] sm:$0xff] }
 0x531   : > { %3050 = vmatprep.subr.mxu1 %v3310_v6  ;;  %3079 = vmatprep.subr.mxu0 %v3310_v6 }
 0x532   : > { %3051 = vmatpush3.msra.mxu1 %v2808_v55  ;;  %3080 = vmatpush3.msra.mxu0 %v2824_v56  ;;  %v2864_v55 = vld [vmem:[%s4834_s9 + $0x2d0] sm:$0xff]  ;;  %v2863_v56 = vld [vmem:[%s4834_s9 + $0x2c8] sm:$0xff] }
 0x533   : > { %3052 = vmatprep.subr.mxu1 %v3310_v6  ;;  %3081 = vmatprep.subr.mxu0 %v3310_v6 }
 0x534   : > { %3053 = vmatpush3.msra.mxu1 %v2807_v57  ;;  %3082 = vmatpush3.msra.mxu0 %v2823_v58  ;;  %v2862_v57 = vld [vmem:[%s4834_s9 + $0x2c0] sm:$0xff]  ;;  %v2861_v58 = vld [vmem:[%s4834_s9 + $0x2b8] sm:$0xff] }
 0x535   : > { %3054 = vmatprep.subr.mxu1 %v3310_v6  ;;  %3083 = vmatprep.subr.mxu0 %v3310_v6 }
 0x536   : > { %3055 = vmatpush3.msra.mxu1 %v2806_v59  ;;  %3084 = vmatpush3.msra.mxu0 %v2822_v60  ;;  %v2860_v59 = vld [vmem:[%s4834_s9 + $0x2b0] sm:$0xff]  ;;  %v2859_v60 = vld [vmem:[%s4834_s9 + $0x2a8] sm:$0xff] }
 0x537   : > { %3056 = vmatprep.subr.mxu1 %v3310_v6  ;;  %3085 = vmatprep.subr.mxu0 %v3310_v6 }
 0x538   : > { %3057 = vmatpush3.msra.mxu1 %v2805_v61  ;;  %3086 = vmatpush3.msra.mxu0 %v2821_v62  ;;  %v2858_v61 = vld [vmem:[%s4834_s9 + $0x2a0] sm:$0xff]  ;;  %v2455_v62 = vrot.slane %v4478_v46, 6 }
 0x539   : > { %3058 = vmatprep.subr.mxu1 %v3310_v6  ;;  %3087 = vmatprep.subr.mxu0 %v3310_v6 }
 0x53a   : > { %3059 = vmatpush3.msra.mxu1 %v2804_v63  ;;  %3088 = vmatpush3.msra.mxu0 %v2820_v0  ;;  %v1905_v63 = vld [vmem:[%s4835_s10] sm:$0x1] }
 0x53b   : > { %3060 = vmatprep.subr.mxu1 %v3310_v6  ;;  %3089 = vmatprep.subr.mxu0 %v3310_v6 }
 0x53c   : > { %3061 = vmatpush3.msra.mxu1 %v2803_v1  ;;  %3090 = vmatpush3.msra.mxu0 %v2819_v2 }
 0x53d   : > { %3062 = vmatprep.subr.mxu1 %v3310_v6  ;;  %3091 = vmatprep.subr.mxu0 %v3310_v6 }
 0x53e   : > { %3063 = vmatpush3.msra.mxu1 %v2802_v3  ;;  %3092 = vmatpush3.msra.mxu0 %v2818_v4 }
 0x53f   : > { %3064 = vmatprep.subr.mxu1 %v3310_v6  ;;  %3093 = vmatprep.subr.mxu0 %v3310_v6 }
 0x540   : > { %3065 = vmatpush3.msra.mxu1 %v2801_v5  ;;  %3094 = vmatpush3.msra.mxu0 %v2817_v7 }
 0x541   : > { %3066 = vmatprep.subr.mxu1 %v3310_v6  ;;  %3095 = vmatprep.subr.mxu0 %v3310_v6 }
 0x542   : > { %3067 = vmatpush3.msra.mxu1 %v2800_v8  ;;  %3096 = vmatpush3.msra.mxu0 %v2816_v9 }
 0x543   : > { %3068 = vmatprep.subr.mxu1 %v3310_v6  ;;  %3097 = vmatprep.subr.mxu0 %v3310_v6 }
 0x544   : > { %3069 = vmatpush3.msra.mxu1 %v2799_v10  ;;  %3098 = vmatpush3.msra.mxu0 %v2815_v11 }
 0x545   : > { %3070 = vmatprep.subr.mxu1 %v3310_v6  ;;  %3099 = vmatprep.subr.mxu0 %v3310_v6 }
 0x546   : > { %3071 = vmatpush3.msra.mxu1 %v2798_v12  ;;  %3100 = vmatpush3.msra.mxu0 %v2814_v13 }
 0x547   : > { %3073 = vmatmul.mubr.msk.f32.vlgmr.msra.gmra.mxu1 %vm1920_vm8, %v2099_v14  ;;  %3101 = vmatprep.subr.mxu0 %v3310_v6 }
 0x548   : > { %3106 = vmatprep.subr.mxu1 %v3310_v6  ;;  %3102 = vmatpush3.msra.mxu0 %v2813_v15 }
 0x549   : > { %3103 = vmatprep.mubr.msk.f32.mxu0 %vm3311_vm7, %v3310_v6  ;;  %3107 = vmatpush3.msra.mxu1 %v2841_v16 }
 0x54a   : > { %3104 = vmatmul.mubr.msk.f32.vlgmr.msra.gmra.mxu0 %vm1920_vm8, %v2188_v17  ;;  %3108 = vmatprep.subr.mxu1 %v3310_v6 }
 0x54b   : > { %3137 = vmatprep.subr.mxu0 %v3310_v6  ;;  %3109 = vmatpush3.msra.mxu1 %v2840_v18 }
 0x54c   : > { %3138 = vmatpush3.msra.mxu0 %v2856_v19  ;;  %3110 = vmatprep.subr.mxu1 %v3310_v6 }
 0x54d   : > { %3139 = vmatprep.subr.mxu0 %v3310_v6  ;;  %3111 = vmatpush3.msra.mxu1 %v2839_v21 }
 0x54e   : > { %3140 = vmatpush3.msra.mxu0 %v2855_v22  ;;  %3112 = vmatprep.subr.mxu1 %v3310_v6 }
 0x54f   : > { %3141 = vmatprep.subr.mxu0 %v3310_v6  ;;  %3113 = vmatpush3.msra.mxu1 %v2838_v23 }
 0x550   : > { %3142 = vmatpush3.msra.mxu0 %v2854_v25  ;;  %3114 = vmatprep.subr.mxu1 %v3310_v6 }
 0x551   : > { %3143 = vmatprep.subr.mxu0 %v3310_v6  ;;  %3115 = vmatpush3.msra.mxu1 %v2837_v26 }
 0x552   : > { %3144 = vmatpush3.msra.mxu0 %v2853_v27  ;;  %3116 = vmatprep.subr.mxu1 %v3310_v6 }
 0x553   : > { %3145 = vmatprep.subr.mxu0 %v3310_v6  ;;  %3117 = vmatpush3.msra.mxu1 %v2836_v28 }
 0x554   : > { %3146 = vmatpush3.msra.mxu0 %v2852_v30  ;;  %3118 = vmatprep.subr.mxu1 %v3310_v6 }
 0x555   : > { %3147 = vmatprep.subr.mxu0 %v3310_v6  ;;  %3119 = vmatpush3.msra.mxu1 %v2835_v31 }
 0x556   : > { %3148 = vmatpush3.msra.mxu0 %v2851_v32  ;;  %3120 = vmatprep.subr.mxu1 %v3310_v6 }
 0x557   : > { %3149 = vmatprep.subr.mxu0 %v3310_v6  ;;  %3121 = vmatpush3.msra.mxu1 %v2834_v33 }
 0x558   : > { %3150 = vmatpush3.msra.mxu0 %v2850_v34  ;;  %3122 = vmatprep.subr.mxu1 %v3310_v6 }
 0x559   : > { %3151 = vmatprep.subr.mxu0 %v3310_v6  ;;  %3123 = vmatpush3.msra.mxu1 %v2833_v35 }
 0x55a   : > { %3152 = vmatpush3.msra.mxu0 %v2849_v36  ;;  %3124 = vmatprep.subr.mxu1 %v3310_v6 }
 0x55b   : > { %3153 = vmatprep.subr.mxu0 %v3310_v6  ;;  %3125 = vmatpush3.msra.mxu1 %v2832_v37 }
 0x55c   : > { %3154 = vmatpush3.msra.mxu0 %v2848_v38  ;;  %3126 = vmatprep.subr.mxu1 %v3310_v6 }
 0x55d   : > { %3155 = vmatprep.subr.mxu0 %v3310_v6  ;;  %3127 = vmatpush3.msra.mxu1 %v2831_v39 }
 0x55e   : > { %3156 = vmatpush3.msra.mxu0 %v2847_v40  ;;  %3128 = vmatprep.subr.mxu1 %v3310_v6 }
 0x55f   : > { %3157 = vmatprep.subr.mxu0 %v3310_v6  ;;  %3129 = vmatpush3.msra.mxu1 %v2830_v29 }
 0x560   : > { %3158 = vmatpush3.msra.mxu0 %v2846_v20  ;;  %3130 = vmatprep.subr.mxu1 %v3310_v6 }
 0x561   : > { %3159 = vmatprep.subr.mxu0 %v3310_v6  ;;  %3131 = vmatpush3.msra.mxu1 %v2829_v24 }
 0x562   : > { %3160 = vmatpush3.msra.mxu0 %v2845_v41  ;;  %3132 = vmatprep.subr.mxu1 %v3310_v6 }
 0x563   : > { %3161 = vmatprep.subr.mxu0 %v3310_v6  ;;  %3133 = vmatpush3.msra.mxu1 %v2828_v42 }
 0x564   : > { %3134 = vmatprep.mubr.msk.f32.mxu1 %vm3311_vm7, %v3310_v6  ;;  %3162 = vmatpush3.msra.mxu0 %v2844_v43 }
 0x565   : > { %3135 = vmatmul.mubr.msk.f32.vlgmr.msra.gmra.mxu1 %vm1920_vm8, %v2277_v44  ;;  %3163 = vmatprep.subr.mxu0 %v3310_v6 }
 0x566   : > { %3168 = vmatprep.subr.mxu1 %v3310_v6  ;;  %3164 = vmatpush3.msra.mxu0 %v2843_v45 }
 0x567   : > { %3165 = vmatprep.mubr.msk.f32.mxu0 %vm3311_vm7, %v3310_v6  ;;  %3169 = vmatpush3.msra.mxu1 %v2871_v47 }
 0x568   : > { %3166 = vmatmul.mubr.msk.f32.vlgmr.msra.gmra.mxu0 %vm1920_vm8, %v2366_v48  ;;  %3170 = vmatprep.subr.mxu1 %v3310_v6 }
 0x569   : > { %3171 = vmatpush3.msra.mxu1 %v2870_v49  ;;  %3196 = vmatprep.mubr.msk.f32.mxu1 %vm3311_vm7, %v3310_v6 }
 0x56a   : > { %3172 = vmatprep.subr.mxu1 %v3310_v6 }
 0x56b   : > { %3173 = vmatpush3.msra.mxu1 %v2869_v50 }
 0x56c   : > { %3174 = vmatprep.subr.mxu1 %v3310_v6 }
 0x56d   : > { %3175 = vmatpush3.msra.mxu1 %v2868_v51 }
 0x56e   : > { %3176 = vmatprep.subr.mxu1 %v3310_v6 }
 0x56f   : > { %3177 = vmatpush3.msra.mxu1 %v2867_v52 }
 0x570   : > { %3178 = vmatprep.subr.mxu1 %v3310_v6 }
 0x571   : > { %3179 = vmatpush3.msra.mxu1 %v2866_v53 }
 0x572   : > { %3180 = vmatprep.subr.mxu1 %v3310_v6 }
 0x573   : > { %3181 = vmatpush3.msra.mxu1 %v2865_v54 }
 0x574   : > { %3182 = vmatprep.subr.mxu1 %v3310_v6 }
 0x575   : > { %3183 = vmatpush3.msra.mxu1 %v2864_v55 }
 0x576   : > { %3184 = vmatprep.subr.mxu1 %v3310_v6 }
 0x577   : > { %3185 = vmatpush3.msra.mxu1 %v2863_v56 }
 0x578   : > { %3186 = vmatprep.subr.mxu1 %v3310_v6 }
 0x579   : > { %3187 = vmatpush3.msra.mxu1 %v2862_v57 }
 0x57a   : > { %3188 = vmatprep.subr.mxu1 %v3310_v6 }
 0x57b   : > { %3189 = vmatpush3.msra.mxu1 %v2861_v58 }
 0x57c   : > { %3190 = vmatprep.subr.mxu1 %v3310_v6 }
 0x57d   : > { %3191 = vmatpush3.msra.mxu1 %v2860_v59 }
 0x57e   : > { %3192 = vmatprep.subr.mxu1 %v3310_v6 }
 0x57f   : > { %3193 = vmatpush3.msra.mxu1 %v2859_v60 }
 0x580   : > { %3194 = vmatprep.subr.mxu1 %v3310_v6 }
 0x581   : > { %3195 = vmatpush3.msra.mxu1 %v2858_v61 }
 0x582   : > { %3197 = vmatmul.mubr.msk.f32.vlgmr.msra.gmra.mxu1 %vm1920_vm8, %v2455_v62 }
 0x5eb   : > { %v1990_v0 = vpop.f32.mrf.mxu1 }
 0x5ec   : > { %v1994_v1 = vadd.f32 %v1990_v0, %v1905_v63 }
 0x5ed   : > { %v3012_v2 = vpop.f32.mrf.mxu1  ;;  %v2079_v3 = vpop.f32.mrf.mxu0 }
 0x5ee   : > { %v2083_v4 = vadd.f32 %v2079_v3, %v1994_v1 }
 0x5ef   : > { %v3043_v5 = vpop.f32.mrf.mxu0 }
 0x607   : > { %v2168_v7 = vpop.f32.mrf.mxu1 }
 0x608   : > { %v2172_v13 = vadd.f32 %v2168_v7, %v2083_v4 }
 0x609   : > { %v3074_v8 = vpop.f32.mrf.mxu1 }
 0x60a   : > { %v2257_v6 = vpop.f32.mrf.mxu0 }
 0x60b   : > { %v2261_v14 = vadd.f32 %v2257_v6, %v2172_v13 }
 0x60c   : > { %v3105_v9 = vpop.f32.mrf.mxu0 }
 0x625   : > { %v2346_v46 = vpop.f32.mrf.mxu1 }
 0x626   : > { %v2350_v15 = vadd.f32 %v2346_v46, %v2261_v14 }
 0x627   : > { %v3136_v10 = vpop.f32.mrf.mxu1 }
 0x628   : > { %v2435_v11 = vpop.f32.mrf.mxu0 }
 0x629   : > { %v2439_v16 = vadd.f32 %v2435_v11, %v2350_v15 }
 0x62a   : > { %v3167_v12 = vpop.f32.mrf.mxu0 }
 0x642   : > { %v2524_v17 = vpop.f32.mrf.mxu1 }
 0x643   : > { %v2528_v18 = vadd.f32 %v2524_v17, %v2439_v16 }
 0x644   : > { %v3198_v19 = vpop.f32.mrf.mxu1 }
 0x645   : > { %2530 = vst.msk [vmem:[%s378_s26] sm:$0x1] %vm2529_vm9, %v2528_v18 }
 0x646   : > { %3261 = shalt.err (!%p3258_p3)
}
 0x647   : > { %s3262_s25 = scalar_lea.hbm %s4790_s14, 16  ;;  %s3266_s12 = scalar_lea.hbm %s4836_s11, 32 }
 0x648   : > { %p3263_p4 = scmp.ne.s32.totalorder %s4790_s14, %s3262_s25  ;;  %p3267_p9 = scmp.lt.s32.totalorder %s4790_s14, %s4836_s11 }
 0x649   : > { %p3268_p10 = scmp.lt.s32.totalorder %s3266_s12, %s3262_s25 }
 0x64a   : > { %p3264_p7 = pnand %p3263_p4, %p3411_p5 }
 0x64b   : > { %p3269_p11 = por %p3268_p10, %p3267_p9 }
 0x64c   : > { %p3265_p8 = pneg %p3264_p7 }
 0x64e   : > { %p3270_p12 = pnand %p3269_p11, %p3265_p8 }
 0x650   : > { %3273 = shalt.err (!%p3270_p12)
}
 0x651   : > { %3207 = dma.vmem_to_hbm [thread:$0]  (%p3411_p5), %s2545_s13, 16, %s4790_s14, %s2532_s15  }
 0x652 PF: > { %p3213_p13 = scmp.ge.s32.totalorder %s3308_s20, 2  ;;  %s2556_s23 = sand.u32 1, %s3296_s17  }
 0x653   : > { %s2557_s16 = scalar_lea.sflag [#allocation3], %s2556_s23 }
 0x654   : > { %p3210_p0 = pnand %p3213_p13, %p3415_p6 }
 0x656   : > { %p3211_p1 = pneg %p3210_p0 }
 0x658   : > { %3291 = dma.done.wait (%p3211_p1), %s2557_s16, 16  }
 0x659   : > { %3293 = vsyncadd (%p3211_p1), %s2557_s16, 4294967280  ;;  %s4845_s20 = sld [smem:[#allocation6_spill]]  ;;  %s4848_s17 = smov %s3300_s18 }
 0x65a   : > { %s4846_s21 = sld [smem:[#allocation5_spill]] }
 0x65b   : > { %s4847_s19 = sld [smem:[#allocation7_spill]] }
 0x65f   : > { %p21_p2 = scmp.ge.s32.totalorder %s4845_s20, 4  }
 0x660   : > { %s4849_s18 = smov %s4846_s21 }
 0x661   :  { %23 = sbr.rel (!%p21_p2) target bundleno = 3 (0x3), region = 113 }
 0x666   :  { %2561 = vsyncpa [#allocation3], 1 }
 0x667   :  { %2563 = vsyncpa [#allocation3 + $0x1], 1 }

</bundles_post_ra>
